<compile_context>
chip_gen: v7x
topology: tpu7x:2x2x1
jax: 0.10.0
libtpu: 0.0.40
codegen_flags: <defaults>
</compile_context>

<pallas_src>
import functools

import jax
import jax.numpy as jnp
from jax.experimental import pallas as pl
from jax.experimental.pallas import tpu as pltpu

EPS = 1e-6


def _round_up(n, m):
    return ((n + m - 1) // m) * m


def _layernorm(z):
    mu = jnp.mean(z, axis=-1, keepdims=True)
    var = jnp.mean((z - mu) ** 2, axis=-1, keepdims=True)
    return (z - mu) * jax.lax.rsqrt(var + EPS)


def _gelu_tanh(z):
    # matches nn.GELU(approximate='tanh')
    c = 0.7978845608028654  # sqrt(2/pi)
    return 0.5 * z * (1.0 + jnp.tanh(c * (z + 0.044715 * z * z * z)))


def concat_block_kernel(x_ref, q_ref,
                        wqkv_ref, bqkv_ref, wproj_ref, bproj_ref,
                        wfc1_ref, bfc1_ref, wfc2_ref, bfc2_ref,
                        xo_ref, qo_ref,
                        *, num_heads, hdp, lx, lq, hd_true):
    x = x_ref[0].astype(jnp.float32)            # (Lx, D)
    q = q_ref[0].astype(jnp.float32)            # (Lq, D)
    h = num_heads
    hw = h * hdp                                # 128-lane aligned head-major width
    scale = 1.0 / (float(hd_true) ** 0.5)

    def ln(z):  # exact LayerNorm over the true hidden dim (no affine)
        mu = jnp.mean(z, axis=-1, keepdims=True)
        c = z - mu
        var = jnp.mean(c * c, axis=-1, keepdims=True)
        return c * jax.lax.rsqrt(var + EPS)

    # ---- pre-norm + concat along the sequence (row) axis ----
    s = jnp.concatenate([ln(x), ln(q)], axis=0).astype(jnp.bfloat16)     # (L, D)

    # ---- fused QKV: single lane-dense matmul, output already head-major ----
    # wqkv_ref: (D, 3*H*hdp) bf16, columns = [q_h0..q_hH | k_h0.. | v_h0..]
    qkv = jnp.dot(s, wqkv_ref[...],
                  preferred_element_type=jnp.float32) + bqkv_ref[...]    # (L, 3*H*hdp)

    def to_heads(z):  # (L, H*hdp) -> (H, L, hdp) via static 32-lane slices
        return jnp.stack([z[:, i * hdp:(i + 1) * hdp] for i in range(h)], axis=0)

    qh = to_heads(qkv[:, :hw]).astype(jnp.bfloat16)
    kh = to_heads(qkv[:, hw:2 * hw]).astype(jnp.bfloat16)
    vh = to_heads(qkv[:, 2 * hw:]).astype(jnp.bfloat16)                  # (H, L, hdp)

    # ---- attention: batched over heads, contraction on trailing dims ----
    scores = jnp.einsum('hld,hmd->hlm', qh, kh,
                        preferred_element_type=jnp.float32) * scale      # (H, L, L)
    scores = scores - jnp.max(scores, axis=-1, keepdims=True)
    p = jnp.exp(scores)
    p = p * pl.reciprocal(jnp.sum(p, axis=-1, keepdims=True), approx=True)
    ctx = jnp.einsum('hlm,hmd->hld', p.astype(jnp.bfloat16), vh,
                     preferred_element_type=jnp.float32)                 # (H, L, hdp)

    # ---- head merge + output projection: single K=128 matmul ----
    ctx_m = jnp.concatenate([ctx[i] for i in range(h)],
                            axis=-1).astype(jnp.bfloat16)                # (L, H*hdp)
    attn = jnp.dot(ctx_m, wproj_ref[...],
                   preferred_element_type=jnp.float32) + bproj_ref[...]  # (L, D)

    # ---- residual after attention ----
    x1 = x + attn[:lx]
    q1 = q + attn[lx:]

    # ---- fused MLP over both streams (shared weights) ----
    z = jnp.concatenate([ln(x1), ln(q1)], axis=0).astype(jnp.bfloat16)   # (L, D)
    h1 = jnp.dot(z, wfc1_ref[...], preferred_element_type=jnp.float32) + bfc1_ref[...]
    h1 = _gelu_tanh(h1)
    mlp = jnp.dot(h1.astype(jnp.bfloat16), wfc2_ref[...],
                  preferred_element_type=jnp.float32) + bfc2_ref[...]    # (L, D)

    xo_ref[0] = (x1 + mlp[:lx]).astype(xo_ref.dtype)
    qo_ref[0] = (q1 + mlp[lx:]).astype(qo_ref.dtype)


def prepare_concat_block_params(params, num_heads):
    """One-time (out of the hot path) weight re-layout / padding / bf16 cast."""
    D = params["wqkv"].shape[0]
    assert D % num_heads == 0
    hd = D // num_heads
    Dp = _round_up(D, 128)
    assert Dp % num_heads == 0, "padded head width must stay lane-friendly"
    hdp = Dp // num_heads                       # per-head padded width; H*hdp % 128 == 0

    wqkv = jnp.asarray(params["wqkv"], jnp.float32)          # (D, 3D) cols = [q|k|v]
    bqkv = jnp.asarray(params["bqkv"], jnp.float32).reshape(-1)

    def pack_cols(w, b):
        # (D, D), (D,) -> (D, H*hdp), (H*hdp,) head-major with zero-padded channels
        w = w.reshape(D, num_heads, hd)
        w = jnp.pad(w, ((0, 0), (0, 0), (0, hdp - hd))).reshape(D, num_heads * hdp)
        b = jnp.pad(b.reshape(num_heads, hd), ((0, 0), (0, hdp - hd))).reshape(-1)
        return w, b

    wq, bq = pack_cols(wqkv[:, :D], bqkv[:D])
    wk, bk = pack_cols(wqkv[:, D:2 * D], bqkv[D:2 * D])
    wv, bv = pack_cols(wqkv[:, 2 * D:], bqkv[2 * D:])
    w_qkv = jnp.concatenate([wq, wk, wv], axis=1).astype(jnp.bfloat16)   # (D, 3*H*hdp)
    b_qkv = jnp.concatenate([bq, bk, bv]).reshape(1, -1).astype(jnp.float32)

    # output projection: rows re-laid head-major with zero-padded channels
    w_proj = jnp.asarray(params["wproj"], jnp.float32).reshape(num_heads, hd, D)
    w_proj = jnp.pad(w_proj, ((0, 0), (0, hdp - hd), (0, 0)))
    w_proj = w_proj.reshape(num_heads * hdp, D).astype(jnp.bfloat16)     # (H*hdp, D)
    b_proj = jnp.asarray(params["bproj"], jnp.float32).reshape(1, D)

    mlp_h = params["wfc1"].shape[1]
    Mp = _round_up(mlp_h, 128)
    w_fc1 = jnp.pad(jnp.asarray(params["wfc1"], jnp.float32),
                    ((0, 0), (0, Mp - mlp_h))).astype(jnp.bfloat16)      # (D, Mp)
    b_fc1 = jnp.pad(jnp.asarray(params["bfc1"], jnp.float32).reshape(-1),
                    (0, Mp - mlp_h)).reshape(1, Mp)
    w_fc2 = jnp.pad(jnp.asarray(params["wfc2"], jnp.float32),
                    ((0, Mp - mlp_h), (0, 0))).astype(jnp.bfloat16)      # (Mp, D)
    b_fc2 = jnp.asarray(params["bfc2"], jnp.float32).reshape(1, D)

    return {"w_qkv": w_qkv, "b_qkv": b_qkv, "w_proj": w_proj, "b_proj": b_proj,
            "w_fc1": w_fc1, "b_fc1": b_fc1, "w_fc2": w_fc2, "b_fc2": b_fc2}


def _full_spec(arr):
    zeros = (0,) * arr.ndim
    return pl.BlockSpec(arr.shape, lambda b, _z=zeros: _z)


def concat_block(x, q, prepared, num_heads):
    B, Lx, D = x.shape
    _, Lq, Dq = q.shape
    assert Dq == D, "query_dim must equal hidden_size (tokens concat on seq axis)"
    assert D % num_heads == 0
    hd = D // num_heads
    hdp = prepared["w_proj"].shape[0] // num_heads   # static from weight shape

    weights = (prepared["w_qkv"], prepared["b_qkv"],
               prepared["w_proj"], prepared["b_proj"],
               prepared["w_fc1"], prepared["b_fc1"],
               prepared["w_fc2"], prepared["b_fc2"])

    kernel = functools.partial(concat_block_kernel, num_heads=num_heads, hdp=hdp,
                               lx=Lx, lq=Lq, hd_true=hd)

    xo, qo = pl.pallas_call(
        kernel,
        out_shape=(jax.ShapeDtypeStruct((B, Lx, D), x.dtype),
                   jax.ShapeDtypeStruct((B, Lq, D), q.dtype)),
        grid=(B,),
        in_specs=[
            pl.BlockSpec((1, Lx, D), lambda b: (b, 0, 0)),
            pl.BlockSpec((1, Lq, D), lambda b: (b, 0, 0)),
        ] + [_full_spec(w) for w in weights],
        out_specs=(pl.BlockSpec((1, Lx, D), lambda b: (b, 0, 0)),
                   pl.BlockSpec((1, Lq, D), lambda b: (b, 0, 0))),
        compiler_params=pltpu.CompilerParams(dimension_semantics=("parallel",)),
    )(x, q, *weights)

    return xo, qo


def reference_concat_block(x, q, params, num_heads):
    """Pure-JAX f32 reference for correctness checking."""
    B, Lx, D = x.shape
    Lq = q.shape[1]
    hd = D // num_heads
    scale = 1.0 / (hd ** 0.5)

    s = jnp.concatenate([_layernorm(x), _layernorm(q)], axis=1)             # (B, L, D)
    qkv = s @ params["wqkv"] + params["bqkv"]                               # (B, L, 3D)
    qh, kh, vh = jnp.split(qkv, 3, axis=-1)

    def heads(z):  # (B, L, D) -> (B, H, L, hd)
        return z.reshape(B, -1, num_heads, hd).transpose(0, 2, 1, 3)

    qh, kh, vh = heads(qh), heads(kh), heads(vh)
    att = jnp.einsum("bhld,bhmd->bhlm", qh, kh) * scale
    att = jax.nn.softmax(att, axis=-1)
    out = jnp.einsum("bhlm,bhmd->bhld", att, vh)
    out = out.transpose(0, 2, 1, 3).reshape(B, Lx + Lq, D)
    out = out @ params["wproj"] + params["bproj"]

    x1 = x + out[:, :Lx]
    q1 = q + out[:, Lx:]

    def mlp(z):
        h1 = _gelu_tanh(z @ params["wfc1"] + params["bfc1"])
        return h1 @ params["wfc2"] + params["bfc2"]

    return x1 + mlp(_layernorm(x1)), q1 + mlp(_layernorm(q1))


if __name__ == "__main__":
    # small shapes: hidden_size = query_dim = 32 (so x and q concat on the
    # sequence axis), num_heads = 4, mlp_ratio = 4 -> mlp_hidden = 128.
    B, Lx, Lq, D, H_HEADS = 2, 16, 8, 32, 4
    MLP_H = int(D * 4.0)

    key = jax.random.PRNGKey(0)
    keys = jax.random.split(key, 10)

    x = jax.random.normal(keys[0], (B, Lx, D), dtype=jnp.float32)
    q = jax.random.normal(keys[1], (B, Lq, D), dtype=jnp.float32)

    params = {
        "wqkv": 0.02 * jax.random.normal(keys[2], (D, 3 * D), jnp.float32),
        "bqkv": 0.02 * jax.random.normal(keys[3], (1, 3 * D), jnp.float32),
        "wproj": 0.02 * jax.random.normal(keys[4], (D, D), jnp.float32),
        "bproj": 0.02 * jax.random.normal(keys[5], (1, D), jnp.float32),
        "wfc1": 0.02 * jax.random.normal(keys[6], (D, MLP_H), jnp.float32),
        "bfc1": 0.02 * jax.random.normal(keys[7], (1, MLP_H), jnp.float32),
        "wfc2": 0.02 * jax.random.normal(keys[8], (MLP_H, D), jnp.float32),
        "bfc2": 0.02 * jax.random.normal(keys[9], (1, D), jnp.float32),
    }

    # One-time weight re-layout (hoisted out of the per-call path).
    prepared = jax.tree_util.tree_map(jax.block_until_ready,
                                      prepare_concat_block_params(params, H_HEADS))

    run = jax.jit(functools.partial(concat_block, num_heads=H_HEADS))
    x_out, q_out = run(x, q, prepared)
    jax.block_until_ready((x_out, q_out))

    x_ref, q_ref = reference_concat_block(x, q, params, num_heads=H_HEADS)
    # bf16 MXU operands + approx softmax reciprocal -> loosened (but still tight) tolerance.
    assert jnp.allclose(x_out, x_ref, atol=2e-2, rtol=2e-2), "x mismatch"
    assert jnp.allclose(q_out, q_ref, atol=2e-2, rtol=2e-2), "q mismatch"

    print("KERNEL_OK")
</pallas_src>

<mosaic_0001>
module attributes {stable_mosaic.version = 11 : i64} {
  func.func @concat_block_kernel(%arg0: i32, %arg1: memref<1x16x32xf32, #tpu.memory_space<vmem>>, %arg2: memref<1x8x32xf32, #tpu.memory_space<vmem>>, %arg3: memref<32x384xbf16, #tpu.memory_space<vmem>>, %arg4: memref<1x384xf32, #tpu.memory_space<vmem>>, %arg5: memref<128x32xbf16, #tpu.memory_space<vmem>>, %arg6: memref<1x32xf32, #tpu.memory_space<vmem>>, %arg7: memref<32x128xbf16, #tpu.memory_space<vmem>>, %arg8: memref<1x128xf32, #tpu.memory_space<vmem>>, %arg9: memref<128x32xbf16, #tpu.memory_space<vmem>>, %arg10: memref<1x32xf32, #tpu.memory_space<vmem>>, %arg11: memref<1x16x32xf32, #tpu.memory_space<vmem>>, %arg12: memref<1x8x32xf32, #tpu.memory_space<vmem>>) attributes {dimension_semantics = [#tpu.dimension_semantics<parallel>], iteration_bounds = array<i64: 2>, scalar_prefetch = 0 : i64, scratch_operands = 0 : i64, tpu.core_type = #tpu.core_type<tc>, window_params = [{transform_indices = @transform_0, window_bounds = array<i64: 1, 16, 32>}, {transform_indices = @transform_1, window_bounds = array<i64: 1, 8, 32>}, {pipeline_mode = #tpu.pipeline_mode<synchronous>, transform_indices = @transform_2, window_bounds = array<i64: 32, 384>}, {pipeline_mode = #tpu.pipeline_mode<synchronous>, transform_indices = @transform_3, window_bounds = array<i64: 1, 384>}, {pipeline_mode = #tpu.pipeline_mode<synchronous>, transform_indices = @transform_4, window_bounds = array<i64: 128, 32>}, {pipeline_mode = #tpu.pipeline_mode<synchronous>, transform_indices = @transform_5, window_bounds = array<i64: 1, 32>}, {pipeline_mode = #tpu.pipeline_mode<synchronous>, transform_indices = @transform_6, window_bounds = array<i64: 32, 128>}, {pipeline_mode = #tpu.pipeline_mode<synchronous>, transform_indices = @transform_7, window_bounds = array<i64: 1, 128>}, {pipeline_mode = #tpu.pipeline_mode<synchronous>, transform_indices = @transform_8, window_bounds = array<i64: 128, 32>}, {pipeline_mode = #tpu.pipeline_mode<synchronous>, transform_indices = @transform_9, window_bounds = array<i64: 1, 32>}, {transform_indices = @transform_10, window_bounds = array<i64: 1, 16, 32>}, {transform_indices = @transform_11, window_bounds = array<i64: 1, 8, 32>}]} {
    %c0 = arith.constant 0 : index
    %c0_0 = arith.constant 0 : index
    %c0_1 = arith.constant 0 : index
    %0 = vector.load %arg1[%c0, %c0_0, %c0_1] : memref<1x16x32xf32, #tpu.memory_space<vmem>>, vector<1x16x32xf32>
    %1 = vector.shape_cast %0 : vector<1x16x32xf32> to vector<16x32xf32>
    %c0_2 = arith.constant 0 : index
    %c0_3 = arith.constant 0 : index
    %c0_4 = arith.constant 0 : index
    %2 = vector.load %arg2[%c0_2, %c0_3, %c0_4] : memref<1x8x32xf32, #tpu.memory_space<vmem>>, vector<1x8x32xf32>
    %3 = vector.shape_cast %2 : vector<1x8x32xf32> to vector<8x32xf32>
    %cst = arith.constant dense<0.000000e+00> : vector<16xf32>
    %4 = vector.multi_reduction <add>, %1, %cst [1] : vector<16x32xf32> to vector<16xf32>
    %5 = vector.shape_cast %4 : vector<16xf32> to vector<16x1xf32>
    %cst_5 = arith.constant 3.200000e+01 : f32
    %6 = vector.broadcast %cst_5 : f32 to vector<16x1xf32>
    %7 = arith.divf %5, %6 : vector<16x1xf32>
    %8 = vector.broadcast %7 : vector<16x1xf32> to vector<16x32xf32>
    %9 = arith.subf %1, %8 : vector<16x32xf32>
    %10 = arith.mulf %9, %9 : vector<16x32xf32>
    %cst_6 = arith.constant dense<0.000000e+00> : vector<16xf32>
    %11 = vector.multi_reduction <add>, %10, %cst_6 [1] : vector<16x32xf32> to vector<16xf32>
    %12 = vector.shape_cast %11 : vector<16xf32> to vector<16x1xf32>
    %cst_7 = arith.constant 3.200000e+01 : f32
    %13 = vector.broadcast %cst_7 : f32 to vector<16x1xf32>
    %14 = arith.divf %12, %13 : vector<16x1xf32>
    %cst_8 = arith.constant 9.99999997E-7 : f32
    %15 = vector.broadcast %cst_8 : f32 to vector<16x1xf32>
    %16 = arith.addf %14, %15 : vector<16x1xf32>
    %17 = math.rsqrt %16 : vector<16x1xf32>
    %18 = vector.broadcast %17 : vector<16x1xf32> to vector<16x32xf32>
    %19 = arith.mulf %9, %18 : vector<16x32xf32>
    %cst_9 = arith.constant dense<0.000000e+00> : vector<8xf32>
    %20 = vector.multi_reduction <add>, %3, %cst_9 [1] : vector<8x32xf32> to vector<8xf32>
    %21 = vector.shape_cast %20 : vector<8xf32> to vector<8x1xf32>
    %cst_10 = arith.constant 3.200000e+01 : f32
    %22 = vector.broadcast %cst_10 : f32 to vector<8x1xf32>
    %23 = arith.divf %21, %22 : vector<8x1xf32>
    %24 = vector.broadcast %23 : vector<8x1xf32> to vector<8x32xf32>
    %25 = arith.subf %3, %24 : vector<8x32xf32>
    %26 = arith.mulf %25, %25 : vector<8x32xf32>
    %cst_11 = arith.constant dense<0.000000e+00> : vector<8xf32>
    %27 = vector.multi_reduction <add>, %26, %cst_11 [1] : vector<8x32xf32> to vector<8xf32>
    %28 = vector.shape_cast %27 : vector<8xf32> to vector<8x1xf32>
    %cst_12 = arith.constant 3.200000e+01 : f32
    %29 = vector.broadcast %cst_12 : f32 to vector<8x1xf32>
    %30 = arith.divf %28, %29 : vector<8x1xf32>
    %cst_13 = arith.constant 9.99999997E-7 : f32
    %31 = vector.broadcast %cst_13 : f32 to vector<8x1xf32>
    %32 = arith.addf %30, %31 : vector<8x1xf32>
    %33 = math.rsqrt %32 : vector<8x1xf32>
    %34 = vector.broadcast %33 : vector<8x1xf32> to vector<8x32xf32>
    %35 = arith.mulf %25, %34 : vector<8x32xf32>
    %36 = tpu.concatenate %19, %35 in 0 : vector<16x32xf32>, vector<8x32xf32> -> vector<24x32xf32>
    %37 = arith.truncf %36 : vector<24x32xf32> to vector<24x32xbf16>
    %c0_14 = arith.constant 0 : index
    %c0_15 = arith.constant 0 : index
    %38 = vector.load %arg3[%c0_14, %c0_15] : memref<32x384xbf16, #tpu.memory_space<vmem>>, vector<32x384xbf16>
    %cst_16 = arith.constant dense<0.000000e+00> : vector<24x384xf32>
    %39 = tpu.matmul %37, %38, %cst_16 {dimension_numbers = #tpu.dot_dimension_numbers<[1], [0], [0], [1], [0, 0, 1, 1], [], []>} : vector<24x32xbf16>, vector<32x384xbf16>, vector<24x384xf32> -> vector<24x384xf32>
    %c0_17 = arith.constant 0 : index
    %c0_18 = arith.constant 0 : index
    %40 = vector.load %arg4[%c0_17, %c0_18] : memref<1x384xf32, #tpu.memory_space<vmem>>, vector<1x384xf32>
    %41 = vector.broadcast %40 : vector<1x384xf32> to vector<24x384xf32>
    %42 = arith.addf %39, %41 : vector<24x384xf32>
    %43 = vector.extract_strided_slice %42 {offsets = [0, 0], sizes = [24, 128], strides = [1, 1]} : vector<24x384xf32> to vector<24x128xf32>
    %44 = vector.extract_strided_slice %43 {offsets = [0, 0], sizes = [24, 32], strides = [1, 1]} : vector<24x128xf32> to vector<24x32xf32>
    %45 = vector.extract_strided_slice %43 {offsets = [0, 32], sizes = [24, 32], strides = [1, 1]} : vector<24x128xf32> to vector<24x32xf32>
    %46 = vector.extract_strided_slice %43 {offsets = [0, 64], sizes = [24, 32], strides = [1, 1]} : vector<24x128xf32> to vector<24x32xf32>
    %47 = vector.extract_strided_slice %43 {offsets = [0, 96], sizes = [24, 32], strides = [1, 1]} : vector<24x128xf32> to vector<24x32xf32>
    %48 = vector.shape_cast %44 : vector<24x32xf32> to vector<1x24x32xf32>
    %49 = vector.shape_cast %45 : vector<24x32xf32> to vector<1x24x32xf32>
    %50 = vector.shape_cast %46 : vector<24x32xf32> to vector<1x24x32xf32>
    %51 = vector.shape_cast %47 : vector<24x32xf32> to vector<1x24x32xf32>
    %52 = tpu.concatenate %48, %49, %50, %51 in 0 : vector<1x24x32xf32>, vector<1x24x32xf32>, vector<1x24x32xf32>, vector<1x24x32xf32> -> vector<4x24x32xf32>
    %53 = arith.truncf %52 : vector<4x24x32xf32> to vector<4x24x32xbf16>
    %54 = vector.extract_strided_slice %42 {offsets = [0, 128], sizes = [24, 128], strides = [1, 1]} : vector<24x384xf32> to vector<24x128xf32>
    %55 = vector.extract_strided_slice %54 {offsets = [0, 0], sizes = [24, 32], strides = [1, 1]} : vector<24x128xf32> to vector<24x32xf32>
    %56 = vector.extract_strided_slice %54 {offsets = [0, 32], sizes = [24, 32], strides = [1, 1]} : vector<24x128xf32> to vector<24x32xf32>
    %57 = vector.extract_strided_slice %54 {offsets = [0, 64], sizes = [24, 32], strides = [1, 1]} : vector<24x128xf32> to vector<24x32xf32>
    %58 = vector.extract_strided_slice %54 {offsets = [0, 96], sizes = [24, 32], strides = [1, 1]} : vector<24x128xf32> to vector<24x32xf32>
    %59 = vector.shape_cast %55 : vector<24x32xf32> to vector<1x24x32xf32>
    %60 = vector.shape_cast %56 : vector<24x32xf32> to vector<1x24x32xf32>
    %61 = vector.shape_cast %57 : vector<24x32xf32> to vector<1x24x32xf32>
    %62 = vector.shape_cast %58 : vector<24x32xf32> to vector<1x24x32xf32>
    %63 = tpu.concatenate %59, %60, %61, %62 in 0 : vector<1x24x32xf32>, vector<1x24x32xf32>, vector<1x24x32xf32>, vector<1x24x32xf32> -> vector<4x24x32xf32>
    %64 = arith.truncf %63 : vector<4x24x32xf32> to vector<4x24x32xbf16>
    %65 = vector.extract_strided_slice %42 {offsets = [0, 256], sizes = [24, 128], strides = [1, 1]} : vector<24x384xf32> to vector<24x128xf32>
    %66 = vector.extract_strided_slice %65 {offsets = [0, 0], sizes = [24, 32], strides = [1, 1]} : vector<24x128xf32> to vector<24x32xf32>
    %67 = vector.extract_strided_slice %65 {offsets = [0, 32], sizes = [24, 32], strides = [1, 1]} : vector<24x128xf32> to vector<24x32xf32>
    %68 = vector.extract_strided_slice %65 {offsets = [0, 64], sizes = [24, 32], strides = [1, 1]} : vector<24x128xf32> to vector<24x32xf32>
    %69 = vector.extract_strided_slice %65 {offsets = [0, 96], sizes = [24, 32], strides = [1, 1]} : vector<24x128xf32> to vector<24x32xf32>
    %70 = vector.shape_cast %66 : vector<24x32xf32> to vector<1x24x32xf32>
    %71 = vector.shape_cast %67 : vector<24x32xf32> to vector<1x24x32xf32>
    %72 = vector.shape_cast %68 : vector<24x32xf32> to vector<1x24x32xf32>
    %73 = vector.shape_cast %69 : vector<24x32xf32> to vector<1x24x32xf32>
    %74 = tpu.concatenate %70, %71, %72, %73 in 0 : vector<1x24x32xf32>, vector<1x24x32xf32>, vector<1x24x32xf32>, vector<1x24x32xf32> -> vector<4x24x32xf32>
    %75 = arith.truncf %74 : vector<4x24x32xf32> to vector<4x24x32xbf16>
    "tpu.trace_start"() <{level = 10 : i32, message = "hld,hmd->hlm"}> : () -> ()
    %cst_19 = arith.constant dense<0.000000e+00> : vector<4x24x24xf32>
    %76 = tpu.matmul %53, %64, %cst_19 {dimension_numbers = #tpu.dot_dimension_numbers<[2], [2], [1], [1], [0, 0, 0, 1, 1, 1], [0], [0]>} : vector<4x24x32xbf16>, vector<4x24x32xbf16>, vector<4x24x24xf32> -> vector<4x24x24xf32>
    "tpu.trace_stop"() : () -> ()
    %cst_20 = arith.constant 0.353553385 : f32
    %77 = vector.broadcast %cst_20 : f32 to vector<4x24x24xf32>
    %78 = arith.mulf %76, %77 : vector<4x24x24xf32>
    %cst_21 = arith.constant dense<0xFF800000> : vector<4x24xf32>
    %79 = vector.multi_reduction <maximumf>, %78, %cst_21 [2] : vector<4x24x24xf32> to vector<4x24xf32>
    %80 = vector.shape_cast %79 : vector<4x24xf32> to vector<4x24x1xf32>
    %81 = vector.broadcast %80 : vector<4x24x1xf32> to vector<4x24x24xf32>
    %82 = arith.subf %78, %81 : vector<4x24x24xf32>
    %83 = math.exp %82 : vector<4x24x24xf32>
    %cst_22 = arith.constant dense<0.000000e+00> : vector<4x24xf32>
    %84 = vector.multi_reduction <add>, %83, %cst_22 [2] : vector<4x24x24xf32> to vector<4x24xf32>
    %85 = vector.shape_cast %84 : vector<4x24xf32> to vector<4x24x1xf32>
    %86 = tpu.reciprocal %85 {approx = true} : vector<4x24x1xf32> -> vector<4x24x1xf32>
    %87 = vector.broadcast %86 : vector<4x24x1xf32> to vector<4x24x24xf32>
    %88 = arith.mulf %83, %87 : vector<4x24x24xf32>
    %89 = arith.truncf %88 : vector<4x24x24xf32> to vector<4x24x24xbf16>
    "tpu.trace_start"() <{level = 10 : i32, message = "hlm,hmd->hld"}> : () -> ()
    %cst_23 = arith.constant dense<0.000000e+00> : vector<4x24x32xf32>
    %90 = tpu.matmul %89, %75, %cst_23 {dimension_numbers = #tpu.dot_dimension_numbers<[2], [1], [1], [2], [0, 0, 0, 1, 1, 2], [0], [0]>} : vector<4x24x24xbf16>, vector<4x24x32xbf16>, vector<4x24x32xf32> -> vector<4x24x32xf32>
    "tpu.trace_stop"() : () -> ()
    %91 = vector.extract_strided_slice %90 {offsets = [0, 0, 0], sizes = [1, 24, 32], strides = [1, 1, 1]} : vector<4x24x32xf32> to vector<1x24x32xf32>
    %92 = vector.shape_cast %91 : vector<1x24x32xf32> to vector<24x32xf32>
    %93 = vector.extract_strided_slice %90 {offsets = [1, 0, 0], sizes = [1, 24, 32], strides = [1, 1, 1]} : vector<4x24x32xf32> to vector<1x24x32xf32>
    %94 = vector.shape_cast %93 : vector<1x24x32xf32> to vector<24x32xf32>
    %95 = vector.extract_strided_slice %90 {offsets = [2, 0, 0], sizes = [1, 24, 32], strides = [1, 1, 1]} : vector<4x24x32xf32> to vector<1x24x32xf32>
    %96 = vector.shape_cast %95 : vector<1x24x32xf32> to vector<24x32xf32>
    %97 = vector.extract_strided_slice %90 {offsets = [3, 0, 0], sizes = [1, 24, 32], strides = [1, 1, 1]} : vector<4x24x32xf32> to vector<1x24x32xf32>
    %98 = vector.shape_cast %97 : vector<1x24x32xf32> to vector<24x32xf32>
    %99 = tpu.concatenate %92, %94, %96, %98 in 1 : vector<24x32xf32>, vector<24x32xf32>, vector<24x32xf32>, vector<24x32xf32> -> vector<24x128xf32>
    %100 = arith.truncf %99 : vector<24x128xf32> to vector<24x128xbf16>
    %c0_24 = arith.constant 0 : index
    %c0_25 = arith.constant 0 : index
    %101 = vector.load %arg5[%c0_24, %c0_25] : memref<128x32xbf16, #tpu.memory_space<vmem>>, vector<128x32xbf16>
    %cst_26 = arith.constant dense<0.000000e+00> : vector<24x32xf32>
    %102 = tpu.matmul %100, %101, %cst_26 {dimension_numbers = #tpu.dot_dimension_numbers<[1], [0], [0], [1], [0, 0, 1, 1], [], []>} : vector<24x128xbf16>, vector<128x32xbf16>, vector<24x32xf32> -> vector<24x32xf32>
    %c0_27 = arith.constant 0 : index
    %c0_28 = arith.constant 0 : index
    %103 = vector.load %arg6[%c0_27, %c0_28] : memref<1x32xf32, #tpu.memory_space<vmem>>, vector<1x32xf32>
    %104 = vector.broadcast %103 : vector<1x32xf32> to vector<24x32xf32>
    %105 = arith.addf %102, %104 : vector<24x32xf32>
    %106 = vector.extract_strided_slice %105 {offsets = [0, 0], sizes = [16, 32], strides = [1, 1]} : vector<24x32xf32> to vector<16x32xf32>
    %107 = arith.addf %1, %106 : vector<16x32xf32>
    %108 = vector.extract_strided_slice %105 {offsets = [16, 0], sizes = [8, 32], strides = [1, 1]} : vector<24x32xf32> to vector<8x32xf32>
    %109 = arith.addf %3, %108 : vector<8x32xf32>
    %cst_29 = arith.constant dense<0.000000e+00> : vector<16xf32>
    %110 = vector.multi_reduction <add>, %107, %cst_29 [1] : vector<16x32xf32> to vector<16xf32>
    %111 = vector.shape_cast %110 : vector<16xf32> to vector<16x1xf32>
    %cst_30 = arith.constant 3.200000e+01 : f32
    %112 = vector.broadcast %cst_30 : f32 to vector<16x1xf32>
    %113 = arith.divf %111, %112 : vector<16x1xf32>
    %114 = vector.broadcast %113 : vector<16x1xf32> to vector<16x32xf32>
    %115 = arith.subf %107, %114 : vector<16x32xf32>
    %116 = arith.mulf %115, %115 : vector<16x32xf32>
    %cst_31 = arith.constant dense<0.000000e+00> : vector<16xf32>
    %117 = vector.multi_reduction <add>, %116, %cst_31 [1] : vector<16x32xf32> to vector<16xf32>
    %118 = vector.shape_cast %117 : vector<16xf32> to vector<16x1xf32>
    %cst_32 = arith.constant 3.200000e+01 : f32
    %119 = vector.broadcast %cst_32 : f32 to vector<16x1xf32>
    %120 = arith.divf %118, %119 : vector<16x1xf32>
    %cst_33 = arith.constant 9.99999997E-7 : f32
    %121 = vector.broadcast %cst_33 : f32 to vector<16x1xf32>
    %122 = arith.addf %120, %121 : vector<16x1xf32>
    %123 = math.rsqrt %122 : vector<16x1xf32>
    %124 = vector.broadcast %123 : vector<16x1xf32> to vector<16x32xf32>
    %125 = arith.mulf %115, %124 : vector<16x32xf32>
    %cst_34 = arith.constant dense<0.000000e+00> : vector<8xf32>
    %126 = vector.multi_reduction <add>, %109, %cst_34 [1] : vector<8x32xf32> to vector<8xf32>
    %127 = vector.shape_cast %126 : vector<8xf32> to vector<8x1xf32>
    %cst_35 = arith.constant 3.200000e+01 : f32
    %128 = vector.broadcast %cst_35 : f32 to vector<8x1xf32>
    %129 = arith.divf %127, %128 : vector<8x1xf32>
    %130 = vector.broadcast %129 : vector<8x1xf32> to vector<8x32xf32>
    %131 = arith.subf %109, %130 : vector<8x32xf32>
    %132 = arith.mulf %131, %131 : vector<8x32xf32>
    %cst_36 = arith.constant dense<0.000000e+00> : vector<8xf32>
    %133 = vector.multi_reduction <add>, %132, %cst_36 [1] : vector<8x32xf32> to vector<8xf32>
    %134 = vector.shape_cast %133 : vector<8xf32> to vector<8x1xf32>
    %cst_37 = arith.constant 3.200000e+01 : f32
    %135 = vector.broadcast %cst_37 : f32 to vector<8x1xf32>
    %136 = arith.divf %134, %135 : vector<8x1xf32>
    %cst_38 = arith.constant 9.99999997E-7 : f32
    %137 = vector.broadcast %cst_38 : f32 to vector<8x1xf32>
    %138 = arith.addf %136, %137 : vector<8x1xf32>
    %139 = math.rsqrt %138 : vector<8x1xf32>
    %140 = vector.broadcast %139 : vector<8x1xf32> to vector<8x32xf32>
    %141 = arith.mulf %131, %140 : vector<8x32xf32>
    %142 = tpu.concatenate %125, %141 in 0 : vector<16x32xf32>, vector<8x32xf32> -> vector<24x32xf32>
    %143 = arith.truncf %142 : vector<24x32xf32> to vector<24x32xbf16>
    %c0_39 = arith.constant 0 : index
    %c0_40 = arith.constant 0 : index
    %144 = vector.load %arg7[%c0_39, %c0_40] : memref<32x128xbf16, #tpu.memory_space<vmem>>, vector<32x128xbf16>
    %cst_41 = arith.constant dense<0.000000e+00> : vector<24x128xf32>
    %145 = tpu.matmul %143, %144, %cst_41 {dimension_numbers = #tpu.dot_dimension_numbers<[1], [0], [0], [1], [0, 0, 1, 1], [], []>} : vector<24x32xbf16>, vector<32x128xbf16>, vector<24x128xf32> -> vector<24x128xf32>
    %c0_42 = arith.constant 0 : index
    %c0_43 = arith.constant 0 : index
    %146 = vector.load %arg8[%c0_42, %c0_43] : memref<1x128xf32, #tpu.memory_space<vmem>>, vector<1x128xf32>
    %147 = vector.broadcast %146 : vector<1x128xf32> to vector<24x128xf32>
    %148 = arith.addf %145, %147 : vector<24x128xf32>
    %cst_44 = arith.constant 5.000000e-01 : f32
    %149 = vector.broadcast %cst_44 : f32 to vector<24x128xf32>
    %150 = arith.mulf %149, %148 : vector<24x128xf32>
    %cst_45 = arith.constant 4.471500e-02 : f32
    %151 = vector.broadcast %cst_45 : f32 to vector<24x128xf32>
    %152 = arith.mulf %151, %148 : vector<24x128xf32>
    %153 = arith.mulf %152, %148 : vector<24x128xf32>
    %154 = arith.mulf %153, %148 : vector<24x128xf32>
    %155 = arith.addf %148, %154 : vector<24x128xf32>
    %cst_46 = arith.constant 0.797884583 : f32
    %156 = vector.broadcast %cst_46 : f32 to vector<24x128xf32>
    %157 = arith.mulf %156, %155 : vector<24x128xf32>
    %158 = math.tanh %157 : vector<24x128xf32>
    %cst_47 = arith.constant 1.000000e+00 : f32
    %159 = vector.broadcast %cst_47 : f32 to vector<24x128xf32>
    %160 = arith.addf %159, %158 : vector<24x128xf32>
    %161 = arith.mulf %150, %160 : vector<24x128xf32>
    %162 = arith.truncf %161 : vector<24x128xf32> to vector<24x128xbf16>
    %c0_48 = arith.constant 0 : index
    %c0_49 = arith.constant 0 : index
    %163 = vector.load %arg9[%c0_48, %c0_49] : memref<128x32xbf16, #tpu.memory_space<vmem>>, vector<128x32xbf16>
    %cst_50 = arith.constant dense<0.000000e+00> : vector<24x32xf32>
    %164 = tpu.matmul %162, %163, %cst_50 {dimension_numbers = #tpu.dot_dimension_numbers<[1], [0], [0], [1], [0, 0, 1, 1], [], []>} : vector<24x128xbf16>, vector<128x32xbf16>, vector<24x32xf32> -> vector<24x32xf32>
    %c0_51 = arith.constant 0 : index
    %c0_52 = arith.constant 0 : index
    %165 = vector.load %arg10[%c0_51, %c0_52] : memref<1x32xf32, #tpu.memory_space<vmem>>, vector<1x32xf32>
    %166 = vector.broadcast %165 : vector<1x32xf32> to vector<24x32xf32>
    %167 = arith.addf %164, %166 : vector<24x32xf32>
    %168 = vector.extract_strided_slice %167 {offsets = [0, 0], sizes = [16, 32], strides = [1, 1]} : vector<24x32xf32> to vector<16x32xf32>
    %169 = arith.addf %107, %168 : vector<16x32xf32>
    %c0_53 = arith.constant 0 : index
    %c0_54 = arith.constant 0 : index
    %c0_55 = arith.constant 0 : index
    %170 = vector.load %arg11[%c0_53, %c0_54, %c0_55] : memref<1x16x32xf32, #tpu.memory_space<vmem>>, vector<1x16x32xf32>
    %171 = vector.shape_cast %170 : vector<1x16x32xf32> to vector<16x32xf32>
    %172 = vector.shape_cast %169 : vector<16x32xf32> to vector<1x16x32xf32>
    tpu.vector_store %arg11[%c0_53, %c0_54, %c0_55], %172 {strides = array<i32>} : memref<1x16x32xf32, #tpu.memory_space<vmem>>, vector<1x16x32xf32>,
    %173 = vector.extract_strided_slice %167 {offsets = [16, 0], sizes = [8, 32], strides = [1, 1]} : vector<24x32xf32> to vector<8x32xf32>
    %174 = arith.addf %109, %173 : vector<8x32xf32>
    %c0_56 = arith.constant 0 : index
    %c0_57 = arith.constant 0 : index
    %c0_58 = arith.constant 0 : index
    %175 = vector.load %arg12[%c0_56, %c0_57, %c0_58] : memref<1x8x32xf32, #tpu.memory_space<vmem>>, vector<1x8x32xf32>
    %176 = vector.shape_cast %175 : vector<1x8x32xf32> to vector<8x32xf32>
    %177 = vector.shape_cast %174 : vector<8x32xf32> to vector<1x8x32xf32>
    tpu.vector_store %arg12[%c0_56, %c0_57, %c0_58], %177 {strides = array<i32>} : memref<1x8x32xf32, #tpu.memory_space<vmem>>, vector<1x8x32xf32>,
    return
  }
  func.func @transform_0(%arg0: i32) -> (i32, i32, i32) {
    %c0_i32 = arith.constant 0 : i32
    %c0_i32_0 = arith.constant 0 : i32
    %c0_i32_1 = arith.constant 0 : i32
    return %arg0, %c0_i32, %c0_i32_0 : i32, i32, i32
  }
  func.func @transform_1(%arg0: i32) -> (i32, i32, i32) {
    %c0_i32 = arith.constant 0 : i32
    %c0_i32_0 = arith.constant 0 : i32
    %c0_i32_1 = arith.constant 0 : i32
    return %arg0, %c0_i32, %c0_i32_0 : i32, i32, i32
  }
  func.func @transform_2(%arg0: i32) -> (i32, i32) {
    %c0_i32 = arith.constant 0 : i32
    %c0_i32_0 = arith.constant 0 : i32
    %c0_i32_1 = arith.constant 0 : i32
    return %c0_i32, %c0_i32_0 : i32, i32
  }
  func.func @transform_3(%arg0: i32) -> (i32, i32) {
    %c0_i32 = arith.constant 0 : i32
    %c0_i32_0 = arith.constant 0 : i32
    %c0_i32_1 = arith.constant 0 : i32
    return %c0_i32, %c0_i32_0 : i32, i32
  }
  func.func @transform_4(%arg0: i32) -> (i32, i32) {
    %c0_i32 = arith.constant 0 : i32
    %c0_i32_0 = arith.constant 0 : i32
    %c0_i32_1 = arith.constant 0 : i32
    return %c0_i32, %c0_i32_0 : i32, i32
  }
  func.func @transform_5(%arg0: i32) -> (i32, i32) {
    %c0_i32 = arith.constant 0 : i32
    %c0_i32_0 = arith.constant 0 : i32
    %c0_i32_1 = arith.constant 0 : i32
    return %c0_i32, %c0_i32_0 : i32, i32
  }
  func.func @transform_6(%arg0: i32) -> (i32, i32) {
    %c0_i32 = arith.constant 0 : i32
    %c0_i32_0 = arith.constant 0 : i32
    %c0_i32_1 = arith.constant 0 : i32
    return %c0_i32, %c0_i32_0 : i32, i32
  }
  func.func @transform_7(%arg0: i32) -> (i32, i32) {
    %c0_i32 = arith.constant 0 : i32
    %c0_i32_0 = arith.constant 0 : i32
    %c0_i32_1 = arith.constant 0 : i32
    return %c0_i32, %c0_i32_0 : i32, i32
  }
  func.func @transform_8(%arg0: i32) -> (i32, i32) {
    %c0_i32 = arith.constant 0 : i32
    %c0_i32_0 = arith.constant 0 : i32
    %c0_i32_1 = arith.constant 0 : i32
    return %c0_i32, %c0_i32_0 : i32, i32
  }
  func.func @transform_9(%arg0: i32) -> (i32, i32) {
    %c0_i32 = arith.constant 0 : i32
    %c0_i32_0 = arith.constant 0 : i32
    %c0_i32_1 = arith.constant 0 : i32
    return %c0_i32, %c0_i32_0 : i32, i32
  }
  func.func @transform_10(%arg0: i32) -> (i32, i32, i32) {
    %c0_i32 = arith.constant 0 : i32
    %c0_i32_0 = arith.constant 0 : i32
    %c0_i32_1 = arith.constant 0 : i32
    return %arg0, %c0_i32, %c0_i32_0 : i32, i32, i32
  }
  func.func @transform_11(%arg0: i32) -> (i32, i32, i32) {
    %c0_i32 = arith.constant 0 : i32
    %c0_i32_0 = arith.constant 0 : i32
    %c0_i32_1 = arith.constant 0 : i32
    return %arg0, %c0_i32, %c0_i32_0 : i32, i32, i32
  }
}

</mosaic_0001>

<bundles_post_ra>
// kernel: concat_block.1
= control target key start
LH: loop header
LB: loop body
LE: loop exit
PB: predicated region body
PF: predicated region fallthrough
CT: control target
= control target key end

     0   :  { %s3052_s0 = inlined_call_operand.vmem [shape: f32[2,16,32], index: 0, kind: input, shape index: {}]   ;;  %s3053_s1 = inlined_call_operand.vmem [shape: f32[2,8,32], index: 1, kind: input, shape index: {}]   ;;  %s3054_s2 = inlined_call_operand.vmem [shape: bf16[32,384], index: 2, kind: input, shape index: {}]   ;;  %s3055_s3 = inlined_call_operand.vmem [shape: f32[1,384], index: 3, kind: input, shape index: {}]   ;;  %s3056_s4 = inlined_call_operand.vmem [shape: bf16[128,32], index: 4, kind: input, shape index: {}]   ;;  %s3057_s5 = inlined_call_operand.vmem [shape: f32[1,32], index: 5, kind: input, shape index: {}]   ;;  %s3058_s6 = inlined_call_operand.vmem [shape: bf16[32,128], index: 6, kind: input, shape index: {}]   ;;  %s3059_s7 = inlined_call_operand.vmem [shape: f32[1,128], index: 7, kind: input, shape index: {}]   ;;  %s3060_s8 = inlined_call_operand.vmem [shape: bf16[128,32], index: 8, kind: input, shape index: {}]   ;;  %s3061_s9 = inlined_call_operand.vmem [shape: f32[1,32], index: 9, kind: input, shape index: {}]   ;;  %s3062_s10 = inlined_call_operand.hbm [shape: f32[2,16,32], index: 10, kind: output, shape index: {0}]   ;;  %s3063_s11 = inlined_call_operand.hbm [shape: f32[2,8,32], index: 11, kind: output, shape index: {1}]  }
   0x1   :  { %3066 = sst [smem:[#allocation8_spill]] %s3052_s0 }
   0x2   :  { %3067 = sst [smem:[#allocation9_spill]] %s3053_s1 }
   0x3   :  { %3068 = sst [smem:[#allocation10_spill]] %s3054_s2 }
   0x4   :  { %3069 = sst [smem:[#allocation11_spill]] %s3055_s3 }
   0x5   :  { %17 = vsyncpa [#allocation3], 0 }
   0x6   :  { %19 = vsyncpa [#allocation3 + $0x1], 0 }
   0x7   :  { %20 = vsyncpa [#allocation5], 0 }
   0x8   :  { %22 = vsyncpa [#allocation5 + $0x1], 0  ;;  %s2577_s17 = smov 0   ;;  %s2579_s18 = smov 0  }
   0x9   :  { %s2581_s19 = smov 0   ;;  %s2583_s20 = smov 0  }
   0xa LB: > { %s2598_s21 = sadd.s32 4294967295, %s2507_s20   ;;  %s1939_s22 = sadd.s32 4294967294, %s2507_s20   ;;  %s2507_s20 = sphi %s2583_s20, %s3080_s20   ;;  %s2503_s19 = sphi %s2581_s19, %s3079_s19   ;;  %s2499_s18 = sphi %s2579_s18, %s3078_s18   ;;  %s2495_s17 = sphi %s2577_s17, %s3077_s17  }
   0xb   : > { %s2602_s23 = sadd.s32 1, %s2507_s20   ;;  %s255_s24 = sadd.s32 1, %s2503_s19 }
   0xc   : > { %s252_s25 = ssub.s32 %s2507_s20, %s2602_s23  ;;  %p265_p0 = scmp.ne.s32.totalorder %s2503_s19, %s2499_s18 }
   0xd   : > { %p253_p1 = scmp.eq.s32.totalorder %s252_s25, 0  ;;  %p266_p2 = scmp.eq.s32.totalorder %s2598_s21, 1 }
   0xe   : > { %p271_p3 = scmp.ne.s32.totalorder %s2499_s18, %s2495_s17  ;;  %p272_p4 = scmp.eq.s32.totalorder %s1939_s22, 1 }
   0xf   : > { %s2613_s26 = scalar_select %p253_p1, %s2503_s19, %s255_s24  }
  0x10   : > { %p2615_p5 = por %p266_p2, %p265_p0  ;;  %p2619_p6 = por %p272_p4, %p271_p3 }
  0x11   : > { %p1942_p7 = scmp.ge.s32.totalorder %s2507_s20, 1  ;;  %p355_p8 = scmp.lt.s32.totalorder %s2507_s20, 3 }
  0x13   : > { %p356_p9 = pnand %p1942_p7, %p355_p8 }
  0x14   : > { %p404_p10 = scmp.lt.s32.totalorder (!%p356_p9), %s2598_s21, 1  ;;  %vm417_vm0 = vcmask (!%p356_p9), 261120   ;;  %s3072_s0 = sld [smem:[#allocation8_spill]] (!%p356_p9)  ;;  %v2509_v27 = vmov (!%p356_p9), 0   ;;  %v470_v45 = vlaneseq (!%p356_p9)  ;;  %vm1135_vm1 = vcmask (!%p356_p9), 1043456  }
  0x15   : > { %359 = sbr.rel (%p356_p9) target bundleno = 2641 (0xa51), region = 60  ;;  %s3073_s1 = sld [smem:[#allocation9_spill]] (!%p356_p9)  ;;  %555 = vmatprep.mubr.bf16.mxu0 (!%p356_p9), %v2509_v27  ;;  %vm988_vm2 = vcmask (!%p356_p9), 195584   ;;  %vm1397_vm3 = vcmask (!%p356_p9), 523264   ;;  %vm1401_vm4 = vcmask (!%p356_p9), 785408  }
  0x16   : > { %s3074_s2 = sld [smem:[#allocation10_spill]] (!%p356_p9)  ;;  %v471_v46 = vshrl.u32 (!%p356_p9), %v470_v45, 7  ;;  %s3075_s3 = sld [smem:[#allocation11_spill]] (!%p356_p9) }
  0x17   : > { %s2512_s13 = smov (!%p356_p9), 64   ;;  %s2001_s22 = sshll.u32 (!%p356_p9), %s2598_s21, 7 }
  0x18   : > { %v472_v47 = vsub.s32 (!%p356_p9), 0, %v471_v46  ;;  %v476_v49 = vsub.s32 (!%p356_p9), 1, %v471_v46  ;;  %v480_v50 = vsub.s32 (!%p356_p9), 2, %v471_v46  ;;  %s2005_s14 = sshll.u32 (!%p356_p9), %s2598_s21, 8 }
  0x19   : > { %s2979_s16 = scalar_lea.hbm (!%p356_p9), %s3062_s10, %s2005_s14 }
  0x1c   : > { %s405_s29 = scalar_select %p404_p10, %s2598_s21, 1  ;;  %v2318_v21 = vld [vmem:[%s3074_s2 + $0x4] ss:$12 sps:$4 sm:$0xff]   ;;  %v2320_v22 = vld [vmem:[%s3074_s2] ss:$12 sps:$4 sm:$0xff]  }
  0x1d   : > { %v2321_v23 = vld [vmem:[%s3074_s2 + $0x8] ss:$12 sps:$4 sm:$0xff]   ;;  %v2325_v25 = vld [vmem:[%s3074_s2 + $0x20] ss:$12 sps:$4 sm:$0xff]   ;;  %523 = vmatprep.subr.bf16.mxu0 %v2318_v21  ;;  %v2324_v26 = vld [vmem:[%s3074_s2 + $0x18] ss:$12 sps:$4 sm:$0xff]  }
  0x1e   : > { %s2004_s30 = sshll.u32 %s405_s29, 4  ;;  %s1947_s12 = sshll.u32 %s405_s29, 3  ;;  %v2322_v24 = vld [vmem:[%s3074_s2 + $0x1c] ss:$12 sps:$4 sm:$0xff]   ;;  %2066 = vmatprep.subr.bf16.mxu1 %v2321_v23  ;;  %524 = vmatpush1.bf16.msra.mxu0 %v2320_v22  ;;  %v468_v48 = vld [vmem:[%s3075_s3] sm:$0x7] }
  0x1f   : > { %s2630_s15 = scalar_lea.vmem %s3072_s0, %s2004_s30  ;;  %s2635_s24 = scalar_lea.vmem %s3073_s1, %s1947_s12  ;;  %2067 = vmatpush3.bf16.msra.mxu1 %v2321_v23  ;;  %525 = vmatprep.subr.bf16.mxu0 %v2322_v24  ;;  %v473_v51 = vrot.slane %v468_v48, %v472_v47  ;;  %v477_v53 = vrot.slane %v468_v48, %v476_v49  ;;  %v2671_v55 = vrot.slane %v468_v48, %v480_v50 }
  0x20   : > { %v414_v0 = vld [vmem:[%s2630_s15] sm:$0xff]  ;;  %v415_v2 = vld [vmem:[%s2630_s15 + $0x8] sm:$0xff]  ;;  %2068 = vmatprep.subr.bf16.mxu1 %v2325_v25  ;;  %s3064_s30 = smov 96   ;;  %s2511_s12 = smov 32  }
  0x21   : > { %v416_v1 = vld [vmem:[%s2635_s24] sm:$0xff]  ;;  %v418_v3 = vsel %vm417_vm0, %v414_v0, 0.0  ;;  %v421_v5 = vsel %vm417_vm0, %v415_v2, 0.0 }
  0x22   : > { %v445_v4 = vsel %vm417_vm0, %v416_v1, 0.0  ;;  %419 = vadd.xlane.f32.xlu0 %v418_v3  ;;  %526 = vmatpush1.bf16.msra.mxu0 %v2324_v26 }
  0x23   : > { %446 = vadd.xlane.f32.xlu1 %v445_v4  ;;  %2069 = vmatpush3.bf16.msra.mxu1 %v2325_v25 }
  0x26   : > { %422 = vadd.xlane.f32.xlu0 %v421_v5 }
  0xaf   : > { %v420_v6 = vpop.xlane.xlu0 %419 }
  0xb0   : > { %v447_v7 = vpop.xlane.xlu1 %446  ;;  %v425_v8 = vmul.f32 0.03125, %v420_v6 }
  0xb1   : > { %v448_v9 = vmul.f32 0.03125, %v447_v7 }
  0xb2   : > { %v427_v10 = vsub.f32 %v414_v0, %v425_v8 }
  0xb3   : > { %v449_v11 = vsub.f32 %v416_v1, %v448_v9  ;;  %v423_v12 = vpop.xlane.xlu0 %422 }
  0xb4   : > { %v426_v13 = vmul.f32 0.03125, %v423_v12  ;;  %v429_v14 = vmul.f32 %v427_v10, %v427_v10 }
  0xb5   : > { %v450_v15 = vmul.f32 %v449_v11, %v449_v11 }
  0xb6   : > { %v428_v16 = vsub.f32 %v415_v2, %v426_v13  ;;  %v431_v17 = vsel %vm417_vm0, %v429_v14, 0.0 }
  0xb7   : > { %432 = vadd.xlane.f32.xlu1 %v431_v17  ;;  %v451_v18 = vsel %vm417_vm0, %v450_v15, 0.0 }
  0xb8   : > { %v430_v19 = vmul.f32 %v428_v16, %v428_v16 }
  0xba   : > { %v434_v20 = vsel %vm417_vm0, %v430_v19, 0.0 }
  0xbb   : > { %452 = vadd.xlane.f32.xlu1 %v451_v18  ;;  %435 = vadd.xlane.f32.xlu0 %v434_v20 }
 0x144   : > { %v433_v28 = vpop.xlane.xlu1 %432 }
 0x145   : > { %v437_v29 = vmul.f32 0.03125, %v433_v28 }
 0x147   : > { %v439_v30 = vadd.f32 1e-06, %v437_v29 }
 0x148   : > { %v453_v31 = vpop.xlane.xlu1 %452  ;;  %v436_v32 = vpop.xlane.xlu0 %435 }
 0x149   : > { %v454_v33 = vmul.f32 0.03125, %v453_v31  ;;  %v438_v34 = vmul.f32 0.03125, %v436_v32  ;;  %2344 = vrsqrt.f32 %v439_v30 }
 0x14b   : > { %v455_v35 = vadd.f32 1e-06, %v454_v33  ;;  %v440_v36 = vadd.f32 1e-06, %v438_v34 }
 0x14d   : > { %2346 = vrsqrt.f32 %v455_v35 }
 0x14e   : > { %2348 = vrsqrt.f32 %v440_v36 }
 0x153   : > { %v2345_v37 = vpop.eup %2344 }
 0x154   : > { %v443_v41 = vmul.f32 %v2345_v37, %v427_v10 }
 0x157   : > { %v2347_v38 = vpop.eup %2346 }
 0x158   : > { %v2349_v39 = vpop.eup %2348  ;;  %v457_v40 = vmul.f32 %v2347_v38, %v449_v11 }
 0x159   : > { %v444_v42 = vmul.f32 %v2349_v39, %v428_v16 }
 0x15a   : > { %v459_v43 = vpack.c.bf16 %v457_v40, %v457_v40 }
 0x15b   : > { %v458_v44 = vpack.c.bf16 %v444_v42, %v443_v41 }
 0x15d   : > { %1954 = vmatmul.mubr.msk.bf16.vlgmr.msra.gmra.mrb[0].mxu0 %vm417_vm0, %v458_v44  ;;  %2070 = vmatprep.mubr.msk.bf16.mxu1 %vm417_vm0, %v458_v44 }
 0x15e   : > { %2071 = vmatmul.mubr.msk.bf16.vlgmr.msra.gmra.mrb[0].mxu1 %vm417_vm0, %v459_v43  ;;  %565 = vmatprep.mubr.bf16.mxu0 %v2509_v27 }
 0x165   : > { %1955 = vmatmul.mubr.msk.bf16.gmra.mrb[4].mxu0 %vm417_vm0, %v459_v43 }
 0x230   : > { %v557_v52 = vpop.f32.mrb[0].mxu0 }
 0x231   : > { %v559_v54 = vpop.f32.mrb[1].mxu0  ;;  %v2673_v56 = vpop.f32.mrb[0].mxu1  ;;  %v558_v59 = vadd.f32 %v557_v52, %v473_v51 }
 0x232   : > { %v561_v57 = vpop.f32.mrb[2].mxu0  ;;  %v608_v58 = vpop.f32.mrb[1].mxu1  ;;  %v560_v63 = vadd.f32 %v559_v54, %v477_v53 }
 0x233   : > { %v562_v60 = vadd.f32 %v561_v57, %v473_v51  ;;  %v563_v61 = vpop.f32.mrb[3].mxu0  ;;  %v2073_v62 = vpop.f32.mrb[2].mxu1  ;;  %v609_v2 = vadd.f32 %v608_v58, %v2671_v55 }
 0x234   : > { %v564_v0 = vadd.f32 %v563_v61, %v477_v53  ;;  %v611_v1 = vpop.f32.mrb[3].mxu1 }
 0x235   : > { %v612_v3 = vadd.f32 %v611_v1, %v2671_v55  ;;  %v652_v4 = vpack.c.bf16 %v562_v60, %v558_v59  ;;  %v2283_v5 = vpack.i.bf16 %v562_v60, %v558_v59 }
 0x236   : > { %v2248_v6 = vpack.i.bf16 %v564_v0, %v560_v63  ;;  %v690_v7 = vpack.c.bf16 %v564_v0, %v560_v63  ;;  %v2714_v0 = vadd.f32 %v2673_v56, %v2671_v55 }
 0x237   : > { %2078 = vmatprep.mubr.msk.bf16.mxu0 %vm417_vm0, %v652_v4  ;;  %v2678_v8 = vpack.c.bf16 %v612_v3, %v609_v2  ;;  %v2680_v9 = vpack.i.bf16 %v612_v3, %v609_v2 }
 0x238   : > { %v567_v10 = vpop.f32.mrb[4].mxu0  ;;  %2249 = vrot.lane.b32.xlu0 %v2248_v6, %s3064_s30  ;;  %2186 = vmatprep.subr.msk.bf16.mxu0 %vm417_vm0, %v690_v7  ;;  %v743_v11 = vsel %vm417_vm0, %v690_v7, 0  ;;  %v729_v3 = vpack.c.bf16 %v2714_v0, %v2714_v0 }
 0x239   : > { %v568_v12 = vadd.f32 %v567_v10, %v473_v51  ;;  %v569_v13 = vpop.f32.mrb[5].mxu0  ;;  %2075 = vmatpush3.bf16.xpose.msra.mxu0 %v743_v11 }
 0x23a   : > { %v570_v14 = vadd.f32 %v569_v13, %v477_v53  ;;  %v571_v15 = vpop.f32.mrb[6].mxu0  ;;  %v1137_v55 = vsel %vm1135_vm1, %v729_v3, 0 }
 0x23b   : > { %v572_v16 = vpop.f32.mrb[7].mxu0  ;;  %v2263_v17 = vpack.i.bf16 %v568_v12, %v562_v60  ;;  %v653_v21 = vpack.c.bf16 %v568_v12, %v568_v12 }
 0x23c   : > { %2269 = vrot.lane.b32.xlu0 %v2248_v6, %s2511_s12  ;;  %v691_v18 = vpack.c.bf16 %v570_v14, %v570_v14  ;;  %v2253_v19 = vpack.i.bf16 %v558_v59, %v570_v14 }
 0x23e   : > { %2187 = vmatprep.subr.msk.bf16.mxu0 %vm417_vm0, %v691_v18  ;;  %2254 = vrot.lane.b32.xlu1 %v2253_v19, %s3064_s30  ;;  %v746_v20 = vsel %vm417_vm0, %v691_v18, 0 }
 0x240   : > { %685 = vrot.lane.b32.xlu0 %v570_v14, %s2511_s12 }
 0x241   : > { %2077 = vmatpush3.bf16.xpose.msra.mxu0 %v746_v20 }
 0x242   : > { %2259 = vrot.lane.b32.xlu1 %v2248_v6, %s2512_s13 }
 0x244   : > { %2284 = vrot.lane.b32.xlu0 %v2283_v5, %s2511_s12 }
 0x246   : > { %2264 = vrot.lane.b32.xlu1 %v2263_v17, %s3064_s30 }
 0x248   : > { %2079 = vmatmul.mubr.msk.bf16.vlgmr.msra.gmra.mrb[8].mxu0 %vm417_vm0, %v653_v21 }
 0x24a   : > { %2274 = vrot.lane.b32.xlu1 %v2253_v19, %s2512_s13 }
 0x24e   : > { %2279 = vrot.lane.b32.xlu1 %v2263_v17, %s2512_s13 }
 0x252   : > { %647 = vrot.lane.b32.xlu1 %v568_v12, %s2511_s12 }
 0x2aa   : > { %v2250_v22 = vpop.permute.xlu0 %2249 }
 0x2ab   : > { %v2252_v23 = vunpack.i.h.bf16 %v2250_v22  ;;  %v2251_v24 = vunpack.i.l.bf16 %v2250_v22 }
 0x2ad   : > { %v692_v25 = vpack.c.bf16 %v2252_v23, %v2251_v24 }
 0x2ae   : > { %v2270_v26 = vpop.permute.xlu0 %2269 }
 0x2af   : > { %2188 = vmatprep.subr.msk.bf16.mxu1 %vm417_vm0, %v692_v25  ;;  %v803_v27 = vsel %vm417_vm0, %v692_v25, 0  ;;  %v2272_v31 = vunpack.i.h.bf16 %v2270_v26  ;;  %v2271_v32 = vunpack.i.l.bf16 %v2270_v26 }
 0x2b0   : > { %2083 = vmatpush3.bf16.xpose.msra.mxu1 %v803_v27  ;;  %v2255_v28 = vpop.permute.xlu1 %2254 }
 0x2b1   : > { %v2256_v29 = vunpack.i.l.bf16 %v2255_v28  ;;  %v696_v37 = vpack.c.bf16 %v2272_v31, %v2271_v32  ;;  %v2257_v42 = vunpack.i.h.bf16 %v2255_v28 }
 0x2b2   : > { %v686_v30 = vpop.permute.xlu0 %685 }
 0x2b3   : > { %v693_v33 = vpack.c.bf16 %v2256_v29, %v2256_v29  ;;  %v697_v53 = vpack.c.bf16 %v686_v30, %v686_v30  ;;  %v923_v57 = vsel %vm417_vm0, %v696_v37, 0 }
 0x2b4   : > { %v2260_v34 = vpop.permute.xlu1 %2259 }
 0x2b5   : > { %v2262_v35 = vunpack.i.h.bf16 %v2260_v34  ;;  %v2261_v36 = vunpack.i.l.bf16 %v2260_v34  ;;  %2189 = vmatprep.subr.msk.bf16.mxu1 %vm417_vm0, %v693_v33  ;;  %v806_v40 = vsel %vm417_vm0, %v693_v33, 0  ;;  %v926_v1 = vsel %vm417_vm0, %v697_v53, 0 }
 0x2b6   : > { %v2285_v39 = vpop.permute.xlu0 %2284 }
 0x2b7   : > { %v694_v38 = vpack.c.bf16 %v2262_v35, %v2261_v36  ;;  %v2287_v46 = vunpack.i.h.bf16 %v2285_v39  ;;  %v2286_v47 = vunpack.i.l.bf16 %v2285_v39 }
 0x2b8   : > { %v2265_v41 = vpop.permute.xlu1 %2264  ;;  %2085 = vmatpush3.bf16.xpose.msra.mxu1 %v806_v40 }
 0x2b9   : > { %v2267_v43 = vunpack.i.h.bf16 %v2265_v41  ;;  %v2266_v44 = vunpack.i.l.bf16 %v2265_v41  ;;  %2190 = vmatprep.subr.msk.bf16.mxu0 %vm417_vm0, %v694_v38  ;;  %2192 = vmatprep.subr.msk.bf16.mxu1 %vm417_vm0, %v696_v37  ;;  %v863_v45 = vsel %vm417_vm0, %v694_v38, 0  ;;  %v658_v52 = vpack.c.bf16 %v2287_v46, %v2286_v47 }
 0x2ba   : > { %2091 = vmatpush3.bf16.xpose.msra.mxu0 %v863_v45 }
 0x2bb   : > { %v654_v48 = vpack.c.bf16 %v2266_v44, %v2257_v42  ;;  %v655_v50 = vpack.c.bf16 %v2267_v43, %v2267_v43 }
 0x2bc   : > { %v2275_v49 = vpop.permute.xlu1 %2274 }
 0x2bd   : > { %v2276_v51 = vunpack.i.l.bf16 %v2275_v49  ;;  %2086 = vmatprep.mubr.msk.bf16.mxu1 %vm417_vm0, %v654_v48  ;;  %v2277_v59 = vunpack.i.h.bf16 %v2275_v49 }
 0x2bf   : > { %v695_v54 = vpack.c.bf16 %v2276_v51, %v2276_v51  ;;  %2087 = vmatmul.mubr.msk.bf16.vlgmr.msra.gmra.mrb[4].mxu1 %vm417_vm0, %v655_v50 }
 0x2c0   : > { %v2280_v58 = vpop.permute.xlu1 %2279  ;;  %2099 = vmatpush3.bf16.xpose.msra.mxu1 %v923_v57  ;;  %2102 = vmatprep.mubr.msk.bf16.mxu1 %vm417_vm0, %v658_v52 }
 0x2c1   : > { %v2281_v60 = vunpack.i.l.bf16 %v2280_v58  ;;  %2191 = vmatprep.subr.msk.bf16.mxu0 %vm417_vm0, %v695_v54  ;;  %2193 = vmatprep.subr.msk.bf16.mxu1 %vm417_vm0, %v697_v53  ;;  %v866_v61 = vsel %vm417_vm0, %v695_v54, 0  ;;  %v2282_v62 = vunpack.i.h.bf16 %v2280_v58 }
 0x2c2   : > { %2093 = vmatpush3.bf16.xpose.msra.mxu0 %v866_v61 }
 0x2c3   : > { %v656_v63 = vpack.c.bf16 %v2281_v60, %v2277_v59  ;;  %2106 = vmatprep.subr.bf16.mxu0 %v2678_v8  ;;  %v657_v2 = vpack.c.bf16 %v2282_v62, %v2282_v62 }
 0x2c4   : > { %v648_v4 = vpop.permute.xlu1 %647 }
 0x2c5   : > { %2094 = vmatprep.mubr.msk.bf16.mxu0 %vm417_vm0, %v656_v63  ;;  %v659_v5 = vpack.c.bf16 %v648_v4, %v648_v4 }
 0x2c8   : > { %2101 = vmatpush3.bf16.xpose.msra.mxu1 %v926_v1 }
 0x2c9   : > { %2095 = vmatmul.mubr.msk.bf16.vlgmr.msra.gmra.mrb[12].mxu0 %vm417_vm0, %v657_v2 }
 0x2ca   : > { %2107 = vmatpush3.bf16.msra.mxu0 %v2678_v8 }
 0x2cb   : > { %2194 = vmatprep.subr.msk.bf16.mxu0 %vm1135_vm1, %v729_v3 }
 0x2ce   : > { %2109 = vmatpush3.bf16.msra.mxu0 %v1137_v55 }
 0x2cf   : > { %2103 = vmatmul.mubr.msk.bf16.vlgmr.msra.gmra.mrb[8].mxu1 %vm417_vm0, %v659_v5 }
 0x31b   : > { %v2080_v56 = vpop.f32.mrb[8].mxu0 }
 0x31c   : > { %v978_v6 = vmul.f32 0.35355338, %v2080_v56  ;;  %v782_v7 = vpop.f32.mrb[9].mxu0 }
 0x31d   : > { %v2081_v10 = vpop.f32.mrb[10].mxu0  ;;  %v976_v11 = vmul.f32 0.35355338, %v782_v7 }
 0x31e   : > { %v785_v12 = vpop.f32.mrb[11].mxu0  ;;  %v995_v13 = vsel %vm988_vm2, %v978_v6, -inf }
 0x31f   : > { %v977_v14 = vmul.f32 0.35355338, %v785_v12  ;;  %996 = vmax.xlane.f32.xlu0 %v995_v13  ;;  %v989_v15 = vsel %vm988_vm2, %v976_v11, -inf }
 0x321   : > { %v992_v8 = vsel %vm988_vm2, %v977_v14, -inf }
 0x322   : > { %993 = vmax.xlane.f32.xlu1 %v992_v8 }
 0x323   : > { %990 = vmax.xlane.f32.xlu0 %v989_v15 }
 0x392   : > { %v2088_v16 = vpop.f32.mrb[4].mxu1 }
 0x393   : > { %v2728_v17 = vmul.f32 0.35355338, %v2088_v16  ;;  %v842_v18 = vpop.f32.mrb[5].mxu1 }
 0x394   : > { %v2730_v19 = vmul.f32 0.35355338, %v842_v18  ;;  %v2089_v20 = vpop.f32.mrb[6].mxu1 }
 0x395   : > { %v845_v21 = vpop.f32.mrb[7].mxu1  ;;  %v1004_v22 = vsel %vm988_vm2, %v2728_v17, -inf }
 0x396   : > { %1005 = vmax.xlane.f32.xlu1 %v1004_v22  ;;  %v998_v23 = vsel %vm988_vm2, %v2730_v19, -inf  ;;  %v2738_v29 = vmul.f32 0.35355338, %v845_v21 }
 0x397   : > { %999 = vmax.xlane.f32.xlu0 %v998_v23 }
 0x398   : > { %v1001_v38 = vsel %vm988_vm2, %v2738_v29, -inf }
 0x39c   : > { %v2096_v24 = vpop.f32.mrb[12].mxu0 }
 0x39d   : > { %v902_v25 = vpop.f32.mrb[13].mxu0  ;;  %v2743_v35 = vmul.f32 0.35355338, %v2096_v24 }
 0x39e   : > { %v2736_v26 = vmul.f32 0.35355338, %v902_v25  ;;  %v2097_v27 = vpop.f32.mrb[14].mxu0 }
 0x39f   : > { %v905_v28 = vpop.f32.mrb[15].mxu0  ;;  %v1013_v43 = vsel %vm988_vm2, %v2743_v35, -inf }
 0x3a0   : > { %v983_v30 = vmul.f32 0.35355338, %v905_v28  ;;  %v1007_v31 = vsel %vm988_vm2, %v2736_v26, -inf }
 0x3a1   : > { %1008 = vmax.xlane.f32.xlu0 %v1007_v31 }
 0x3a2   : > { %v2104_v32 = vpop.f32.mrb[8].mxu1  ;;  %v1010_v33 = vsel %vm988_vm2, %v983_v30, -inf }
 0x3a3   : > { %v962_v34 = vpop.f32.mrb[9].mxu1  ;;  %1011 = vmax.xlane.f32.xlu1 %v1010_v33  ;;  %v2749_v40 = vmul.f32 0.35355338, %v2104_v32 }
 0x3a4   : > { %v2745_v36 = vmul.f32 0.35355338, %v962_v34  ;;  %v2105_v37 = vpop.f32.mrb[10].mxu1 }
 0x3a5   : > { %v965_v39 = vpop.f32.mrb[11].mxu1  ;;  %1002 = vmax.xlane.f32.xlu0 %v1001_v38  ;;  %v1022_v44 = vsel %vm988_vm2, %v2749_v40, -inf }
 0x3a6   : > { %v1016_v41 = vsel %vm988_vm2, %v2745_v36, -inf  ;;  %v2753_v42 = vmul.f32 0.35355338, %v965_v39 }
 0x3a7   : > { %1017 = vmax.xlane.f32.xlu1 %v1016_v41 }
 0x3a8   : > { %v1019_v45 = vsel %vm988_vm2, %v2753_v42, -inf }
 0x3a9   : > { %1014 = vmax.xlane.f32.xlu0 %v1013_v43 }
 0x3ab   : > { %1023 = vmax.xlane.f32.xlu1 %v1022_v44 }
 0x3ac   : > { %v997_v46 = vpop.xlane.xlu0 %996 }
 0x3ad   : > { %1020 = vmax.xlane.f32.xlu0 %v1019_v45  ;;  %v1027_v47 = vsub.f32 %v978_v6, %v997_v46 }
 0x3af   : > { %v994_v49 = vpop.xlane.xlu1 %993  ;;  %v1041_v50 = vmul.f32 1.442695, %v1027_v47 }
 0x3b0   : > { %v991_v48 = vpop.xlane.xlu0 %990  ;;  %v1026_v52 = vsub.f32 %v977_v14, %v994_v49 }
 0x3b1   : > { %v1025_v51 = vsub.f32 %v976_v11, %v991_v48  ;;  %2350 = vpow2.f32 %v1041_v50 }
 0x3b2   : > { %v1039_v54 = vmul.f32 1.442695, %v1026_v52 }
 0x3b3   : > { %v1037_v53 = vmul.f32 1.442695, %v1025_v51 }
 0x3b5   : > { %2352 = vpow2.f32 %v1037_v53 }
 0x3b6   : > { %2354 = vpow2.f32 %v1039_v54 }
 0x3bb   : > { %v2769_v57 = vpop.eup %2350 }
 0x3bc   : > { %705 = vrot.lane.b32.xlu1 %v2714_v0, %s3064_s30  ;;  %v1067_v58 = vsel %vm988_vm2, %v2769_v57, 0.0 }
 0x3bf   : > { %v2773_v59 = vpop.eup %2352 }
 0x3c0   : > { %2294 = vrot.lane.b32.xlu1 %v2680_v9, %s2512_s13  ;;  %v1061_v60 = vsel %vm988_vm2, %v2773_v59, 0.0 }
 0x3c3   : > { %2289 = vrot.lane.b32.xlu0 %v2680_v9, %s3064_s30  ;;  %s3076_s30 = smov 96  }
 0x3c4   : > { %2299 = vrot.lane.b32.xlu1 %v2680_v9, %s2511_s12  ;;  %v2775_v9 = vpop.eup %2354 }
 0x3c5   : > { %v1064_v61 = vsel %vm988_vm2, %v2775_v9, 0.0 }
 0x3e2   : > { %1068 = vadd.xlane.f32.xlu0 %v1067_v58 }
 0x3e6   : > { %1062 = vadd.xlane.f32.xlu0 %v1061_v60 }
 0x3e8   : > { %1065 = vadd.xlane.f32.xlu1 %v1064_v61 }
 0x423   : > { %v1006_v62 = vpop.xlane.xlu1 %1005 }
 0x424   : > { %v1030_v63 = vsub.f32 %v2728_v17, %v1006_v62  ;;  %v1000_v1 = vpop.xlane.xlu0 %999 }
 0x425   : > { %v1028_v2 = vsub.f32 %v2730_v19, %v1000_v1 }
 0x426   : > { %v1047_v3 = vmul.f32 1.442695, %v1030_v63 }
 0x427   : > { %v1043_v4 = vmul.f32 1.442695, %v1028_v2 }
 0x428   : > { %2356 = vpow2.f32 %v1047_v3 }
 0x429   : > { %2358 = vpow2.f32 %v1043_v4 }
 0x42e   : > { %v1009_v5 = vpop.xlane.xlu0 %1008 }
 0x42f   : > { %v1031_v13 = vsub.f32 %v2736_v26, %v1009_v5 }
 0x430   : > { %v1012_v55 = vpop.xlane.xlu1 %1011 }
 0x431   : > { %v1032_v56 = vsub.f32 %v983_v30, %v1012_v55  ;;  %v1049_v18 = vmul.f32 1.442695, %v1031_v13 }
 0x432   : > { %v2783_v6 = vpop.eup %2356  ;;  %v1003_v7 = vpop.xlane.xlu0 %1002 }
 0x433   : > { %v1051_v10 = vmul.f32 1.442695, %v1032_v56  ;;  %v1076_v11 = vsel %vm988_vm2, %v2783_v6, 0.0  ;;  %v2787_v12 = vpop.eup %2358  ;;  %v1029_v19 = vsub.f32 %v2738_v29, %v1003_v7 }
 0x434   : > { %1077 = vadd.xlane.f32.xlu1 %v1076_v11  ;;  %v1018_v14 = vpop.xlane.xlu1 %1017  ;;  %v1070_v17 = vsel %vm988_vm2, %v2787_v12, 0.0 }
 0x435   : > { %2360 = vpow2.f32 %v1051_v10  ;;  %v1034_v15 = vsub.f32 %v2745_v36, %v1018_v14  ;;  %v1045_v26 = vmul.f32 1.442695, %v1029_v19 }
 0x436   : > { %v1015_v8 = vpop.xlane.xlu0 %1014 }
 0x437   : > { %v1033_v16 = vsub.f32 %v2743_v35, %v1015_v8  ;;  %v1055_v24 = vmul.f32 1.442695, %v1034_v15 }
 0x438   : > { %1071 = vadd.xlane.f32.xlu1 %v1070_v17  ;;  %v1024_v20 = vpop.xlane.xlu1 %1023 }
 0x439   : > { %v1053_v21 = vmul.f32 1.442695, %v1033_v16  ;;  %v1036_v22 = vsub.f32 %v2749_v40, %v1024_v20 }
 0x43a   : > { %v1021_v23 = vpop.xlane.xlu0 %1020 }
 0x43b   : > { %2362 = vpow2.f32 %v1053_v21  ;;  %v1059_v25 = vmul.f32 1.442695, %v1036_v22  ;;  %v1035_v28 = vsub.f32 %v2753_v42, %v1021_v23 }
 0x43c   : > { %2364 = vpow2.f32 %v1049_v18  ;;  %v706_v27 = vpop.permute.xlu1 %705 }
 0x43d   : > { %2366 = vpow2.f32 %v1059_v25  ;;  %v1057_v35 = vmul.f32 1.442695, %v1035_v28  ;;  %v731_v39 = vpack.c.bf16 %v706_v27, %v706_v27 }
 0x43e   : > { %v2290_v30 = vpop.permute.xlu0 %2289  ;;  %2368 = vpow2.f32 %v1055_v24 }
 0x43f   : > { %v2797_v31 = vpop.eup %2360  ;;  %v2292_v29 = vunpack.i.h.bf16 %v2290_v30  ;;  %v2291_v32 = vunpack.i.l.bf16 %v2290_v30  ;;  %2370 = vpow2.f32 %v1045_v26  ;;  %v1194_v48 = vsel %vm1135_vm1, %v731_v39, 0 }
 0x440   : > { %v2295_v33 = vpop.permute.xlu1 %2294  ;;  %v1082_v34 = vsel %vm988_vm2, %v2797_v31, 0.0  ;;  %2372 = vpow2.f32 %v1057_v35 }
 0x441   : > { %v730_v36 = vpack.c.bf16 %v2292_v29, %v2291_v32  ;;  %v2297_v37 = vunpack.i.h.bf16 %v2295_v33  ;;  %v2296_v38 = vunpack.i.l.bf16 %v2295_v33  ;;  %1083 = vadd.xlane.f32.xlu1 %v1082_v34 }
 0x443   : > { %v732_v40 = vpack.c.bf16 %v2297_v37, %v2296_v38  ;;  %2114 = vmatprep.subr.bf16.mxu1 %v730_v36 }
 0x444   : > { %2115 = vmatpush3.bf16.msra.mxu1 %v730_v36  ;;  %v2300_v41 = vpop.permute.xlu1 %2299 }
 0x445   : > { %v2801_v42 = vpop.eup %2362  ;;  %v2302_v43 = vunpack.i.h.bf16 %v2300_v41  ;;  %v2301_v44 = vunpack.i.l.bf16 %v2300_v41  ;;  %2195 = vmatprep.subr.msk.bf16.mxu1 %vm1135_vm1, %v731_v39  ;;  %2122 = vmatprep.subr.bf16.mxu0 %v732_v40 }
 0x446   : > { %v2804_v45 = vpop.eup %2364  ;;  %v1085_v46 = vsel %vm988_vm2, %v2801_v42, 0.0 }
 0x447   : > { %v2808_v47 = vpop.eup %2366  ;;  %v2811_v49 = vpack.c.bf16 %v2302_v43, %v2301_v44  ;;  %1086 = vadd.xlane.f32.xlu0 %v1085_v46  ;;  %v1079_v53 = vsel %vm988_vm2, %v2804_v45, 0.0  ;;  %v2326_v44 = vld [vmem:[%s3056_s4] sm:$0xff]   ;;  %v2328_v46 = vld [vmem:[%s3056_s4 + $0x10] sm:$0xff]  }
 0x448   : > { %2117 = vmatpush3.bf16.msra.mxu1 %v1194_v48  ;;  %v1094_v50 = vsel %vm988_vm2, %v2808_v47, 0.0  ;;  %v2815_v51 = vpop.eup %2368 }
 0x449   : > { %1095 = vadd.xlane.f32.xlu1 %v1094_v50  ;;  %2130 = vmatprep.subr.bf16.mxu1 %v2811_v49  ;;  %v2818_v52 = vpop.eup %2370  ;;  %v1088_v54 = vsel %vm988_vm2, %v2815_v51, 0.0 }
 0x44a   : > { %v1073_v58 = vsel %vm988_vm2, %v2818_v52, 0.0  ;;  %v2826_v60 = vpop.eup %2372 }
 0x44b   : > { %1080 = vadd.xlane.f32.xlu0 %v1079_v53  ;;  %v1091_v61 = vsel %vm988_vm2, %v2826_v60, 0.0  ;;  %v2331_v53 = vld [vmem:[%s3056_s4 + $0x28] sm:$0xff]  }
 0x44d   : > { %1089 = vadd.xlane.f32.xlu1 %v1088_v54 }
 0x44f   : > { %1074 = vadd.xlane.f32.xlu0 %v1073_v58  ;;  %v2332_v58 = vld [vmem:[%s3056_s4 + $0x30] sm:$0xff]  }
 0x453   : > { %1092 = vadd.xlane.f32.xlu0 %v1091_v61 }
 0x45e   : > { %723 = vrot.lane.b32.xlu1 %v2714_v0, %s2511_s12 }
 0x469   : > { %714 = vrot.lane.b32.xlu0 %v2714_v0, %s2512_s13 }
 0x46f   : > { %v1069_v62 = vpop.xlane.xlu0 %1068 }
 0x470   : > { %2374 = vrcp.f32 %v1069_v62 }
 0x473   : > { %v1063_v63 = vpop.xlane.xlu0 %1062 }
 0x474   : > { %2376 = vrcp.f32 %v1063_v63 }
 0x475   : > { %v1066_v1 = vpop.xlane.xlu1 %1065 }
 0x476   : > { %2378 = vrcp.f32 %v1066_v1 }
 0x47a   : > { %v2375_v2 = vpop.eup %2374 }
 0x47b   : > { %v1111_v5 = vmul.f32 %v2375_v2, %v2769_v57  ;;  %v2333_v2 = vld [vmem:[%s3056_s4 + $0x38] sm:$0xff]  }
 0x47d   : > { %v1122_v10 = vpack.c.bf16 %v1111_v5, %v1111_v5 }
 0x47e   : > { %v2377_v3 = vpop.eup %2376 }
 0x47f   : > { %v1109_v55 = vmul.f32 %v2377_v3, %v2773_v59 }
 0x480   : > { %v2379_v4 = vpop.eup %2378 }
 0x481   : > { %v1110_v56 = vmul.f32 %v2379_v4, %v2775_v9 }
 0x483   : > { %v1121_v7 = vpack.c.bf16 %v1110_v56, %v1109_v55 }
 0x485   : > { %2110 = vmatprep.mubr.msk.bf16.mxu0 %vm988_vm2, %v1121_v7 }
 0x486   : > { %2111 = vmatmul.mubr.msk.bf16.vlgmr.msra.gmra.mrb[16].mxu0 %vm988_vm2, %v1122_v10 }
 0x487   : > { %2123 = vmatpush3.bf16.msra.mxu0 %v732_v40 }
 0x4c1   : > { %v1078_v0 = vpop.xlane.xlu1 %1077 }
 0x4c5   : > { %v1072_v11 = vpop.xlane.xlu1 %1071 }
 0x4ce   : > { %v1084_v13 = vpop.xlane.xlu1 %1083 }
 0x4cf   : > { %2380 = vrcp.f32 %v1084_v13 }
 0x4d4   : > { %v1087_v14 = vpop.xlane.xlu0 %1086 }
 0x4d5   : > { %2382 = vrcp.f32 %v1087_v14 }
 0x4d6   : > { %v1096_v8 = vpop.xlane.xlu1 %1095 }
 0x4d8   : > { %v1081_v15 = vpop.xlane.xlu0 %1080 }
 0x4d9   : > { %2384 = vrcp.f32 %v1081_v15  ;;  %v2381_v16 = vpop.eup %2380 }
 0x4da   : > { %2386 = vrcp.f32 %v1078_v0  ;;  %v1090_v57 = vpop.xlane.xlu1 %1089  ;;  %v1116_v22 = vmul.f32 %v2381_v16, %v2797_v31 }
 0x4db   : > { %2388 = vrcp.f32 %v1072_v11 }
 0x4dc   : > { %v1075_v59 = vpop.xlane.xlu0 %1074 }
 0x4dd   : > { %2390 = vrcp.f32 %v1075_v59 }
 0x4de   : > { %2392 = vrcp.f32 %v1090_v57  ;;  %v724_v34 = vpop.permute.xlu1 %723 }
 0x4df   : > { %v2383_v17 = vpop.eup %2382  ;;  %v735_v40 = vpack.c.bf16 %v724_v34, %v724_v34 }
 0x4e0   : > { %v1093_v9 = vpop.xlane.xlu0 %1092  ;;  %v1117_v24 = vmul.f32 %v2383_v17, %v2801_v42 }
 0x4e1   : > { %2394 = vrcp.f32 %v1093_v9  ;;  %v1308_v42 = vsel %vm1135_vm1, %v735_v40, 0 }
 0x4e2   : > { %2396 = vrcp.f32 %v1096_v8  ;;  %v1126_v33 = vpack.c.bf16 %v1117_v24, %v1117_v24 }
 0x4e3   : > { %v2385_v18 = vpop.eup %2384 }
 0x4e4   : > { %v2387_v19 = vpop.eup %2386  ;;  %v715_v20 = vpop.permute.xlu0 %714  ;;  %v1115_v21 = vmul.f32 %v2385_v18, %v2804_v45  ;;  %v2327_v45 = vld [vmem:[%s3056_s4 + $0x8] sm:$0xff]  }
 0x4e5   : > { %v2389_v23 = vpop.eup %2388  ;;  %v733_v25 = vpack.c.bf16 %v715_v20, %v715_v20  ;;  %v1114_v28 = vmul.f32 %v2387_v19, %v2783_v6 }
 0x4e6   : > { %v1125_v26 = vpack.c.bf16 %v1116_v22, %v1115_v21  ;;  %v1112_v29 = vmul.f32 %v2389_v23, %v2787_v12 }
 0x4e7   : > { %v2391_v27 = vpop.eup %2390  ;;  %v1251_v30 = vsel %vm1135_vm1, %v733_v25, 0  ;;  %2196 = vmatprep.subr.msk.bf16.mxu0 %vm1135_vm1, %v733_v25  ;;  %v1124_v37 = vpack.c.bf16 %v1114_v28, %v1114_v28 }
 0x4e8   : > { %2125 = vmatpush3.bf16.msra.mxu0 %v1251_v30  ;;  %2126 = vmatprep.mubr.msk.bf16.mxu0 %vm988_vm2, %v1125_v26  ;;  %v1113_v32 = vmul.f32 %v2391_v27, %v2818_v52  ;;  %v2393_v31 = vpop.eup %2392  ;;  %v2330_v52 = vld [vmem:[%s3056_s4 + $0x20] sm:$0xff]  }
 0x4e9   : > { %v1118_v38 = vmul.f32 %v2393_v31, %v2815_v51  ;;  %2138 = vmatprep.subr.bf16.mxu0 %v2326_v44  ;;  %v2329_v51 = vld [vmem:[%s3056_s4 + $0x18] sm:$0xff]   ;;  %v1974_v31 = vld [vmem:[%s3057_s5] ss:$0 sm:$0xff] }
 0x4ea   : > { %v1123_v35 = vpack.c.bf16 %v1113_v32, %v1112_v29 }
 0x4eb   : > { %v2395_v36 = vpop.eup %2394  ;;  %2127 = vmatmul.mubr.msk.bf16.vlgmr.msra.gmra.mrb[20].mxu0 %vm988_vm2, %v1126_v33 }
 0x4ec   : > { %v2397_v6 = vpop.eup %2396  ;;  %2118 = vmatprep.mubr.msk.bf16.mxu1 %vm988_vm2, %v1123_v35  ;;  %v1119_v39 = vmul.f32 %v2395_v36, %v2826_v60  ;;  %2139 = vmatpush3.bf16.msra.mxu0 %v2326_v44 }
 0x4ed   : > { %2119 = vmatmul.mubr.msk.bf16.vlgmr.msra.gmra.mrb[12].mxu1 %vm988_vm2, %v1124_v37  ;;  %v1120_v41 = vmul.f32 %v2397_v6, %v2808_v47  ;;  %2140 = vmatprep.subr.bf16.mxu0 %v2327_v45 }
 0x4ee   : > { %2131 = vmatpush3.bf16.msra.mxu1 %v2811_v49  ;;  %v1127_v12 = vpack.c.bf16 %v1119_v39, %v1118_v38  ;;  %v2410_v38 = vld [vmem:[%s2630_s15] sm:$0xff] }
 0x4ef   : > { %2197 = vmatprep.subr.msk.bf16.mxu1 %vm1135_vm1, %v735_v40  ;;  %v1128_v43 = vpack.c.bf16 %v1120_v41, %v1120_v41 }
 0x4f0   : > { %2134 = vmatprep.mubr.msk.bf16.mxu1 %vm988_vm2, %v1127_v12  ;;  %2141 = vmatpush3.bf16.msra.mxu0 %v2327_v45  ;;  %v2411_v12 = vld [vmem:[%s2635_s24] sm:$0xff]  ;;  %s2513_s24 = smov [#allocation4]  }
 0x4f1   : > { %2142 = vmatprep.subr.bf16.mxu0 %v2328_v46  ;;  %s2417_s2 = sshll.u32 %s2513_s24, 4  ;;  %s2418_s2 = int_to_ptr.vmem [resolvable:$false] %s2417_s2 }
 0x4f2   : > { %2133 = vmatpush3.bf16.msra.mxu1 %v1308_v42  ;;  %v2412_v42 = vld [vmem:[%s2630_s15 + $0x8] sm:$0xff]  ;;  %s2419_s21 = scalar_lea.vmem %s2418_s2, 256 }
 0x4f4   : > { %2143 = vmatpush3.bf16.msra.mxu0 %v2328_v46 }
 0x4f5   : > { %2135 = vmatmul.mubr.msk.bf16.vlgmr.msra.gmra.mrb[16].mxu1 %vm988_vm2, %v1128_v43  ;;  %2144 = vmatprep.subr.bf16.mxu0 %v2329_v51 }
 0x4f8   : > { %2145 = vmatpush3.bf16.msra.mxu0 %v2329_v51 }
 0x4f9   : > { %2146 = vmatprep.subr.bf16.mxu0 %v2330_v52 }
 0x4fc   : > { %2147 = vmatpush3.bf16.msra.mxu0 %v2330_v52 }
 0x4fd   : > { %2148 = vmatprep.subr.bf16.mxu0 %v2331_v53 }
 0x500   : > { %2149 = vmatpush3.bf16.msra.mxu0 %v2331_v53 }
 0x501   : > { %2150 = vmatprep.subr.bf16.mxu0 %v2332_v58 }
 0x504   : > { %2151 = vmatpush3.bf16.msra.mxu0 %v2332_v58 }
 0x505   : > { %2152 = vmatprep.subr.bf16.mxu0 %v2333_v2 }
 0x508   : > { %2153 = vmatpush3.bf16.msra.mxu0 %v2333_v2 }
 0x559   : > { %v2112_v47 = vpop.f32.mrb[16].mxu0 }
 0x55a   : > { %v1173_v48 = vpop.f32.mrb[17].mxu0 }
 0x55b   : > { %v2113_v49 = vpop.f32.mrb[18].mxu0 }
 0x55c   : > { %v1176_v50 = vpop.f32.mrb[19].mxu0 }
 0x5be   : > { %v2128_v54 = vpop.f32.mrb[20].mxu0 }
 0x5bf   : > { %v1287_v60 = vpop.f32.mrb[21].mxu0 }
 0x5c0   : > { %v2120_v61 = vpop.f32.mrb[12].mxu1  ;;  %v2129_v62 = vpop.f32.mrb[22].mxu0 }
 0x5c1   : > { %1365 = vrot.lane.b32.xlu1 %v2120_v61, %s2511_s12  ;;  %v1230_v63 = vpop.f32.mrb[13].mxu1  ;;  %v1290_v1 = vpop.f32.mrb[23].mxu0 }
 0x5c2   : > { %v2308_v3 = vpack.i.bf16 %v1290_v1, %v1287_v60  ;;  %v2121_v4 = vpop.f32.mrb[14].mxu1 }
 0x5c3   : > { %v1233_v5 = vpop.f32.mrb[15].mxu1  ;;  %v2335_v4 = vld [vmem:[%s3058_s6 + $0x8] sm:$0xff]  }
 0x5c4   : > { %v2303_v55 = vpack.i.bf16 %v1233_v5, %v1230_v63 }
 0x5c5   : > { %1377 = vrot.lane.b32.xlu1 %v2128_v54, %s2512_s13 }
 0x5c6   : > { %2304 = vrot.lane.b32.xlu0 %v2303_v55, %s2511_s12  ;;  %s2955_s12 = sand.u32 1, %s2499_s18  }
 0x5c7   : > { %s1944_s15 = sshll.u32 %s2955_s12, 3 }
 0x5c8   : > { %v2136_v56 = vpop.f32.mrb[16].mxu1  ;;  %s403_s25 = scalar_lea.vmem [#allocation4], %s1944_s15  ;;  %s2971_s15 = scalar_lea.hbm %s3063_s11, %s2001_s22 }
 0x5c9   : > { %v1344_v7 = vpop.f32.mrb[17].mxu1  ;;  %1389 = vrot.lane.b32.xlu1 %v2136_v56, %s3076_s30  ;;  %s1836_s29 = sshll.u32 %s403_s25, 4  ;;  %s1807_s22 = scalar_lea.sflag [#allocation5], %s2955_s12  ;;  %s2973_s29 = int_to_ptr.vmem [resolvable:$true] %s1836_s29 }
 0x5ca   : > { %v2137_v10 = vpop.f32.mrb[18].mxu1  ;;  %2309 = vrot.lane.b32.xlu0 %v2308_v3, %s2512_s13  ;;  %v2334_v3 = vld [vmem:[%s3058_s6] sm:$0xff]   ;;  %s1943_s13 = sshll.u32 %s2955_s12, 4  ;;  %p2420_p0 = scmp.lt.s32.totalorder %s2973_s29, %s2418_s2 }
 0x5cb   : > { %v1347_v0 = vpop.f32.mrb[19].mxu1  ;;  %2158 = vmatprep.subr.bf16.mxu1 %v2334_v3  ;;  %s2963_s0 = scalar_lea.vmem [#allocation2], %s1943_s13 }
 0x5cc   : > { %v2313_v11 = vpack.i.bf16 %v1347_v0, %v1344_v7  ;;  %2159 = vmatpush3.bf16.msra.mxu1 %v2334_v3  ;;  %s1820_s1 = sshll.u32 %s2963_s0, 4  ;;  %s2981_s1 = int_to_ptr.vmem [resolvable:$true] %s1820_s1 }
 0x5cd   : > { %2160 = vmatprep.subr.bf16.mxu1 %v2335_v4 }
 0x5ce   : > { %2314 = vrot.lane.b32.xlu0 %v2313_v11, %s3076_s30  ;;  %s2413_s30 = scalar_lea.vmem %s2973_s29, 128 }
 0x5cf   : > { %p2414_p11 = scmp.ne.s32.totalorder %s2973_s29, %s2413_s30  ;;  %p2421_p1 = scmp.lt.s32.totalorder %s2419_s21, %s2413_s30 }
 0x5d0   : > { %2161 = vmatpush3.bf16.msra.mxu1 %v2335_v4 }
 0x5d1   : > { %p2415_p12 = pnand %p2414_p11, %p2615_p5  ;;  %p2422_p2 = por %p2421_p1, %p2420_p0 }
 0x5d3   : > { %p2416_p13 = pneg %p2415_p12 }
 0x5d5   : > { %p2423_p3 = pnand %p2422_p2, %p2416_p13 }
 0x633   : > { %v1366_v13 = vpop.permute.xlu1 %1365 }
 0x634   : > { %v1396_v17 = vsel %vm417_vm0, %v2112_v47, %v1366_v13 }
 0x637   : > { %v1378_v8 = vpop.permute.xlu1 %1377 }
 0x638   : > { %v2305_v14 = vpop.permute.xlu0 %2304  ;;  %v1400_v19 = vsel %vm1397_vm3, %v1396_v17, %v1378_v8 }
 0x639   : > { %v2307_v57 = vunpack.i.h.bf16 %v2305_v14  ;;  %v2306_v59 = vunpack.i.l.bf16 %v2305_v14 }
 0x63b   : > { %v1390_v18 = vpop.permute.xlu1 %1389  ;;  %v1395_v21 = vsel %vm417_vm0, %v1176_v50, %v2307_v57  ;;  %v1394_v22 = vsel %vm417_vm0, %v1173_v48, %v2306_v59 }
 0x63c   : > { %v2310_v15 = vpop.permute.xlu0 %2309  ;;  %v1404_v25 = vsel %vm1401_vm4, %v1400_v19, %v1390_v18  ;;  %v2336_v19 = vld [vmem:[%s3060_s8] sm:$0xff]  }
 0x63d   : > { %v2312_v9 = vunpack.i.h.bf16 %v2310_v15  ;;  %v2311_v16 = vunpack.i.l.bf16 %v2310_v15  ;;  %v1406_v32 = vpack.c.bf16 %v1404_v25, %v1404_v25  ;;  %2166 = vmatprep.subr.bf16.mxu1 %v2336_v19  ;;  %v2342_v25 = vld [vmem:[%s3060_s8 + $0x30] sm:$0xff]  }
 0x63f   : > { %v1399_v26 = vsel %vm1397_vm3, %v1395_v21, %v2312_v9  ;;  %v1398_v27 = vsel %vm1397_vm3, %v1394_v22, %v2311_v16  ;;  %v2338_v21 = vld [vmem:[%s3060_s8 + $0x10] sm:$0xff]   ;;  %v2339_v22 = vld [vmem:[%s3060_s8 + $0x18] sm:$0xff]  }
 0x640   : > { %v2315_v20 = vpop.permute.xlu0 %2314 }
 0x641   : > { %v2317_v23 = vunpack.i.h.bf16 %v2315_v20  ;;  %v2316_v24 = vunpack.i.l.bf16 %v2315_v20  ;;  %v2337_v20 = vld [vmem:[%s3060_s8 + $0x8] sm:$0xff]  }
 0x643   : > { %v1402_v28 = vsel %vm1401_vm4, %v1398_v27, %v2316_v24  ;;  %v1403_v30 = vsel %vm1401_vm4, %v1399_v26, %v2317_v23  ;;  %v2340_v23 = vld [vmem:[%s3060_s8 + $0x20] sm:$0xff]   ;;  %v2341_v24 = vld [vmem:[%s3060_s8 + $0x28] sm:$0xff]   ;;  %v2343_v26 = vld [vmem:[%s3060_s8 + $0x38] sm:$0xff]  }
 0x644   : > { %v1405_v29 = vpack.c.bf16 %v1403_v30, %v1402_v28  ;;  %v1983_v27 = vld [vmem:[%s3059_s7] ss:$0 sm:$0xff] }
 0x646   : > { %2154 = vmatprep.mubr.bf16.mxu0 %v1405_v29 }
 0x647   : > { %2155 = vmatmul.mubr.bf16.vlgmr.msra.gmra.mrb[24].mxu0 %v1406_v32 }
 0x71a   : > { %v2156_v33 = vpop.f32.mrb[24].mxu0 }
 0x71b   : > { %v1512_v34 = vpop.f32.mrb[25].mxu0  ;;  %v1521_v35 = vadd.f32 %v2156_v33, %v1974_v31 }
 0x71c   : > { %v1513_v36 = vadd.f32 %v1974_v31, %v1512_v34  ;;  %v2157_v37 = vpop.f32.mrb[26].mxu0 }
 0x71d   : > { %v1515_v6 = vpop.f32.mrb[27].mxu0  ;;  %v2902_v41 = vadd.f32 %v2411_v12, %v1521_v35 }
 0x71e   : > { %v2899_v39 = vadd.f32 %v2410_v38, %v1513_v36  ;;  %v1516_v40 = vadd.f32 %v1974_v31, %v1515_v6 }
 0x71f   : > { %v1555_v46 = vsel %vm417_vm0, %v2902_v41, 0.0 }
 0x720   : > { %v2905_v43 = vadd.f32 %v2412_v42, %v1516_v40  ;;  %v1529_v44 = vsel %vm417_vm0, %v2899_v39, 0.0 }
 0x721   : > { %1530 = vadd.xlane.f32.xlu0 %v1529_v44 }
 0x722   : > { %v1532_v45 = vsel %vm417_vm0, %v2905_v43, 0.0 }
 0x723   : > { %1533 = vadd.xlane.f32.xlu1 %v1532_v45 }
 0x725   : > { %1556 = vadd.xlane.f32.xlu0 %v1555_v46 }
 0x7ae   : > { %v1531_v47 = vpop.xlane.xlu0 %1530 }
 0x7af   : > { %v1535_v48 = vmul.f32 0.03125, %v1531_v47 }
 0x7b0   : > { %v1534_v49 = vpop.xlane.xlu1 %1533 }
 0x7b1   : > { %v1537_v50 = vsub.f32 %v2899_v39, %v1535_v48  ;;  %v1536_v51 = vmul.f32 0.03125, %v1534_v49 }
 0x7b2   : > { %v1557_v52 = vpop.xlane.xlu0 %1556 }
 0x7b3   : > { %v1538_v53 = vsub.f32 %v2905_v43, %v1536_v51  ;;  %v1558_v54 = vmul.f32 0.03125, %v1557_v52  ;;  %v1539_v58 = vmul.f32 %v1537_v50, %v1537_v50 }
 0x7b5   : > { %v1559_v60 = vsub.f32 %v2902_v41, %v1558_v54  ;;  %v1541_v61 = vsel %vm417_vm0, %v1539_v58, 0.0  ;;  %v1540_v62 = vmul.f32 %v1538_v53, %v1538_v53 }
 0x7b6   : > { %1542 = vadd.xlane.f32.xlu0 %v1541_v61 }
 0x7b7   : > { %v1560_v63 = vmul.f32 %v1559_v60, %v1559_v60  ;;  %v1544_v1 = vsel %vm417_vm0, %v1540_v62, 0.0 }
 0x7b9   : > { %v1561_v2 = vsel %vm417_vm0, %v1560_v63, 0.0 }
 0x7ba   : > { %1545 = vadd.xlane.f32.xlu0 %v1544_v1  ;;  %1562 = vadd.xlane.f32.xlu1 %v1561_v2 }
 0x843   : > { %v1543_v5 = vpop.xlane.xlu0 %1542 }
 0x844   : > { %v1547_v55 = vmul.f32 0.03125, %v1543_v5 }
 0x846   : > { %v1549_v56 = vadd.f32 1e-06, %v1547_v55  ;;  %v1988_v55 = vld [vmem:[%s3061_s9] ss:$0 sm:$0xff] }
 0x847   : > { %v1563_v7 = vpop.xlane.xlu1 %1562  ;;  %v1546_v10 = vpop.xlane.xlu0 %1545 }
 0x848   : > { %v1564_v0 = vmul.f32 0.03125, %v1563_v7  ;;  %v1548_v11 = vmul.f32 0.03125, %v1546_v10  ;;  %2398 = vrsqrt.f32 %v1549_v56 }
 0x84a   : > { %v1565_v13 = vadd.f32 1e-06, %v1564_v0  ;;  %v1550_v14 = vadd.f32 1e-06, %v1548_v11 }
 0x84c   : > { %2400 = vrsqrt.f32 %v1565_v13 }
 0x84d   : > { %2402 = vrsqrt.f32 %v1550_v14 }
 0x852   : > { %v2399_v8 = vpop.eup %2398 }
 0x853   : > { %v1553_v9 = vmul.f32 %v2399_v8, %v1537_v50 }
 0x856   : > { %v2401_v15 = vpop.eup %2400 }
 0x857   : > { %v2403_v57 = vpop.eup %2402  ;;  %v1567_v59 = vmul.f32 %v2401_v15, %v1559_v60 }
 0x858   : > { %v1554_v16 = vmul.f32 %v2403_v57, %v1538_v53 }
 0x859   : > { %v1569_v17 = vpack.c.bf16 %v1567_v59, %v1567_v59 }
 0x85a   : > { %v1568_v18 = vpack.c.bf16 %v1554_v16, %v1553_v9 }
 0x85c   : > { %2162 = vmatprep.mubr.msk.bf16.mxu1 %vm417_vm0, %v1568_v18 }
 0x85d   : > { %2163 = vmatmul.mubr.msk.bf16.vlgmr.msra.gmra.mrb[20].mxu1 %vm417_vm0, %v1569_v17 }
 0x85e   : > { %2167 = vmatpush3.bf16.msra.mxu1 %v2336_v19 }
 0x85f   : > { %2168 = vmatprep.subr.bf16.mxu1 %v2337_v20 }
 0x862   : > { %2169 = vmatpush3.bf16.msra.mxu1 %v2337_v20 }
 0x863   : > { %2170 = vmatprep.subr.bf16.mxu1 %v2338_v21 }
 0x866   : > { %2171 = vmatpush3.bf16.msra.mxu1 %v2338_v21 }
 0x867   : > { %2172 = vmatprep.subr.bf16.mxu1 %v2339_v22 }
 0x86a   : > { %2173 = vmatpush3.bf16.msra.mxu1 %v2339_v22 }
 0x86b   : > { %2174 = vmatprep.subr.bf16.mxu1 %v2340_v23 }
 0x86e   : > { %2175 = vmatpush3.bf16.msra.mxu1 %v2340_v23 }
 0x86f   : > { %2176 = vmatprep.subr.bf16.mxu1 %v2341_v24 }
 0x872   : > { %2177 = vmatpush3.bf16.msra.mxu1 %v2341_v24 }
 0x873   : > { %2178 = vmatprep.subr.bf16.mxu1 %v2342_v25 }
 0x876   : > { %2179 = vmatpush3.bf16.msra.mxu1 %v2342_v25 }
 0x877   : > { %2180 = vmatprep.subr.bf16.mxu1 %v2343_v26 }
 0x87a   : > { %2181 = vmatpush3.bf16.msra.mxu1 %v2343_v26 }
 0x930   : > { %v2164_v28 = vpop.f32.mrb[20].mxu1 }
 0x931   : > { %v1642_v30 = vadd.f32 %v2164_v28, %v1983_v27  ;;  %v1633_v29 = vpop.f32.mrb[21].mxu1 }
 0x932   : > { %v1634_v32 = vadd.f32 %v1983_v27, %v1633_v29  ;;  %v2165_v31 = vpop.f32.mrb[22].mxu1 }
 0x933   : > { %v1652_v33 = vmul.f32 0.044715, %v1642_v30  ;;  %v1636_v34 = vpop.f32.mrb[23].mxu1  ;;  %v1649_v60 = vmul.f32 0.5, %v1642_v30 }
 0x934   : > { %v1650_v35 = vmul.f32 0.044715, %v1634_v32  ;;  %v1637_v36 = vadd.f32 %v1983_v27, %v1636_v34  ;;  %v1647_v61 = vmul.f32 0.5, %v1634_v32 }
 0x935   : > { %v1655_v37 = vmul.f32 %v1652_v33, %v1642_v30 }
 0x936   : > { %v1653_v6 = vmul.f32 %v1650_v35, %v1634_v32  ;;  %v1651_v38 = vmul.f32 0.044715, %v1637_v36  ;;  %v1648_v62 = vmul.f32 0.5, %v1637_v36 }
 0x937   : > { %v1658_v40 = vmul.f32 %v1655_v37, %v1642_v30 }
 0x938   : > { %v1656_v12 = vmul.f32 %v1653_v6, %v1634_v32  ;;  %v1654_v42 = vmul.f32 %v1651_v38, %v1637_v36 }
 0x939   : > { %v1661_v44 = vadd.f32 %v1658_v40, %v1642_v30 }
 0x93a   : > { %v1657_v45 = vmul.f32 %v1654_v42, %v1637_v36  ;;  %v1659_v46 = vadd.f32 %v1656_v12, %v1634_v32 }
 0x93b   : > { %v1664_v47 = vmul.f32 0.7978846, %v1661_v44 }
 0x93c   : > { %v1660_v48 = vadd.f32 %v1657_v45, %v1637_v36  ;;  %v1662_v49 = vmul.f32 0.7978846, %v1659_v46 }
 0x93d   : > { %2404 = vtanh.f32 %v1664_v47 }
 0x93e   : > { %v1663_v50 = vmul.f32 0.7978846, %v1660_v48  ;;  %2406 = vtanh.f32 %v1662_v49 }
 0x940   : > { %2408 = vtanh.f32 %v1663_v50 }
 0x947   : > { %v2405_v51 = vpop.eup %2404 }
 0x948   : > { %v2407_v52 = vpop.eup %2406  ;;  %v1670_v53 = vadd.f32 1.0, %v2405_v51 }
 0x949   : > { %v1668_v54 = vadd.f32 1.0, %v2407_v52 }
 0x94a   : > { %v2409_v58 = vpop.eup %2408  ;;  %v1673_v1 = vmul.f32 %v1670_v53, %v1649_v60 }
 0x94b   : > { %v1669_v63 = vadd.f32 1.0, %v2409_v58  ;;  %v1671_v2 = vmul.f32 %v1668_v54, %v1647_v61 }
 0x94c   : > { %v1675_v5 = vpack.c.bf16 %v1673_v1, %v1673_v1 }
 0x94d   : > { %v1672_v3 = vmul.f32 %v1669_v63, %v1648_v62 }
 0x94f   : > { %v1674_v4 = vpack.c.bf16 %v1672_v3, %v1671_v2 }
 0x951   : > { %2182 = vmatprep.mubr.bf16.mxu1 %v1674_v4 }
 0x952   : > { %2183 = vmatmul.mubr.bf16.vlgmr.msra.gmra.mrb[24].mxu1 %v1675_v5 }
 0xa25   : > { %v2184_v56 = vpop.f32.mrb[24].mxu1 }
 0xa26   : > { %v1790_v7 = vadd.f32 %v2184_v56, %v1988_v55  ;;  %v1781_v10 = vpop.f32.mrb[25].mxu1 }
 0xa27   : > { %v1782_v0 = vadd.f32 %v1988_v55, %v1781_v10  ;;  %v2185_v11 = vpop.f32.mrb[26].mxu1 }
 0xa28   : > { %v1799_v13 = vadd.f32 %v1790_v7, %v2902_v41  ;;  %v1784_v14 = vpop.f32.mrb[27].mxu1 }
 0xa29   : > { %v1795_v8 = vadd.f32 %v1782_v0, %v2899_v39  ;;  %v1785_v15 = vadd.f32 %v1988_v55, %v1784_v14 }
 0xa2a   : > { %1800 = vst.msk [vmem:[%s403_s25] sm:$0xff] %vm417_vm0, %v1799_v13 }
 0xa2b   : > { %1797 = vst.msk [vmem:[%s2963_s0] sm:$0xff] %vm417_vm0, %v1795_v8  ;;  %v1796_v41 = vadd.f32 %v1785_v15, %v2905_v43 }
 0xa2c   : > { %2426 = shalt.err (!%p2423_p3)
}
 0xa2d   : > { %s2427_s25 = scalar_lea.hbm %s2971_s15, 128  ;;  %s2431_s24 = scalar_lea.hbm %s3063_s11, 256 }
 0xa2e   : > { %p2428_p4 = scmp.ne.s32.totalorder %s2971_s15, %s2427_s25  ;;  %p2432_p9 = scmp.lt.u32.totalorder %s2971_s15, %s3063_s11 }
 0xa2f   : > { %p2433_p10 = scmp.lt.u32.totalorder %s2431_s24, %s2427_s25  ;;  %p2435_p12 = scmp.lt.u32.totalorder %s2427_s25, %s2971_s15 }
 0xa30   : > { %p2429_p7 = pnand %p2428_p4, %p2615_p5 }
 0xa31   : > { %p2434_p11 = por %p2433_p10, %p2432_p9 }
 0xa32   : > { %p2430_p8 = pneg %p2429_p7 }
 0xa33   : > { %p2436_p13 = por %p2435_p12, %p2434_p11 }
 0xa35   : > { %p2437_p0 = pnand %p2436_p13, %p2430_p8 }
 0xa37   : > { %2440 = shalt.err (!%p2437_p0)
}
 0xa38   : > { %2199 = dma.vmem_to_hbm [thread:$0]  (%p2615_p5), %s2973_s29, 128, %s2971_s15, %s1807_s22   ;;  %1798 = vst.msk [vmem:[%s2963_s0 + $0x8] sm:$0xff] %vm417_vm0, %v1796_v41 }
 0xa39   : > { %s1802_s3 = scalar_lea.sflag [#allocation3], %s2955_s12  ;;  %s2441_s30 = scalar_lea.vmem %s2981_s1, 256 }
 0xa3a   : > { %p2442_p1 = scmp.ne.s32.totalorder %s2981_s1, %s2441_s30  ;;  %s2514_s21 = smov [#allocation2]  }
 0xa3b   : > { %s2445_s25 = sshll.u32 %s2514_s21, 4  ;;  %s2446_s25 = int_to_ptr.vmem [resolvable:$false] %s2445_s25 }
 0xa3c   : > { %p2443_p2 = pnand %p2442_p1, %p2615_p5  ;;  %s2447_s14 = scalar_lea.vmem %s2446_s25, 512 }
 0xa3d   : > { %p2448_p4 = scmp.lt.s32.totalorder %s2981_s1, %s2446_s25  ;;  %p2449_p7 = scmp.lt.s32.totalorder %s2447_s14, %s2441_s30 }
 0xa3e   : > { %p2444_p3 = pneg %p2443_p2 }
 0xa3f   : > { %p2450_p8 = por %p2449_p7, %p2448_p4 }
 0xa41   : > { %p2451_p9 = pnand %p2450_p8, %p2444_p3 }
 0xa43   : > { %2454 = shalt.err (!%p2451_p9)
}
 0xa44   : > { %s2455_s29 = scalar_lea.hbm %s2979_s16, 256  ;;  %s2459_s22 = scalar_lea.hbm %s3062_s10, 512 }
 0xa45   : > { %p2456_p10 = scmp.ne.s32.totalorder %s2979_s16, %s2455_s29  ;;  %p2460_p13 = scmp.lt.u32.totalorder %s2979_s16, %s3062_s10 }
 0xa46   : > { %p2461_p0 = scmp.lt.u32.totalorder %s2459_s22, %s2455_s29  ;;  %p2463_p2 = scmp.lt.u32.totalorder %s2455_s29, %s2979_s16 }
 0xa47   : > { %p2457_p11 = pnand %p2456_p10, %p2615_p5 }
 0xa48   : > { %p2462_p1 = por %p2461_p0, %p2460_p13 }
 0xa49   : > { %p2458_p12 = pneg %p2457_p11 }
 0xa4a   : > { %p2464_p3 = por %p2463_p2, %p2462_p1 }
 0xa4c   : > { %p2465_p4 = pnand %p2464_p3, %p2458_p12 }
 0xa4e   : > { %2468 = shalt.err (!%p2465_p4)
}
 0xa4f   : > { %s2515_s2 = smov 128   ;;  %s2516_s30 = smov 8  }
 0xa50   : > { %2198 = dma.vmem_to_hbm [thread:$0]  (%p2615_p5), %s2981_s1, 256, %s2979_s16, %s1802_s3, %s2515_s2, %s2515_s2, %s2516_s30  }
 0xa51 PF: > { %p2209_p7 = scmp.ge.s32.totalorder %s2507_s20, 2  ;;  %s1848_s21 = sand.u32 1, %s2495_s17  }
 0xa52   : > { %s1849_s25 = scalar_lea.sflag [#allocation3], %s1848_s21 }
 0xa53   : > { %p2203_p8 = pnand %p2209_p7, %p2619_p6 }
 0xa55   : > { %2486 = dma.done.wait (!%p2203_p8), %s1849_s25, 256  }
 0xa56   : > { %2488 = vsyncadd (!%p2203_p8), %s1849_s25, 4294967040  ;;  %s1858_s14 = scalar_lea.sflag [#allocation5], %s1848_s21 }
 0xa57   : > { %2490 = dma.done.wait (!%p2203_p8), %s1858_s14, 128  }
 0xa58   : > { %2492 = vsyncadd (!%p2203_p8), %s1858_s14, 4294967168  ;;  %p25_p5 = scmp.ge.s32.totalorder %s2602_s23, 4   ;;  %s3077_s17 = smov %s2499_s18 }
 0xa59   : > { %s3078_s18 = smov %s2503_s19  ;;  %s3079_s19 = smov %s2613_s26 }
 0xa5a   : > { %s3080_s20 = smov %s2602_s23  ;;  %27 = sbr.rel (!%p25_p5) target bundleno = 10 (0xa), region = 115 }
 0xa61   :  { %1863 = vsyncpa [#allocation3], 1 }
 0xa62   :  { %1865 = vsyncpa [#allocation3 + $0x1], 1 }
 0xa63   :  { %1866 = vsyncpa [#allocation5], 1 }
 0xa64   :  { %1868 = vsyncpa [#allocation5 + $0x1], 1 }

</bundles_post_ra>
